<compile_context>
chip_gen: v7x
topology: tpu7x:2x2x1
jax: 0.10.0
libtpu: 0.0.40
codegen_flags: <defaults>
</compile_context>

<pallas_src>
import jax
import jax.numpy as jnp
from jax.experimental import pallas as pl
from jax.experimental.pallas import tpu as pltpu

LEAKY_SLOPE = 0.01   # nn.LeakyReLU default
LN_EPS = 1e-5        # nn.LayerNorm default


# ----------------------------------------------------------------------------
# Fused Pallas kernel
# ----------------------------------------------------------------------------
def make_fused_kernel(n_layers1, n_layers2, activate_last, layer_norm):
    ln = activate_last and layer_norm

    def leaky(t):
        return jnp.maximum(t, LEAKY_SLOPE * t)

    def mlp_tail(h, rest, gamma_ref, beta_ref, n_layers):
        # `h` is the pre-activation output of layer 0.
        if n_layers > 1 or activate_last:
            h = leaky(h)
        for l, (w_ref, b_ref) in enumerate(rest):          # layers 1..n_layers-1
            h = jnp.dot(h, w_ref[...], preferred_element_type=jnp.float32) + b_ref[...]
            if l < n_layers - 2 or activate_last:
                h = leaky(h)
        if ln:
            mu = jnp.mean(h, axis=-1, keepdims=True)
            var = jnp.mean((h - mu) ** 2, axis=-1, keepdims=True)
            h = (h - mu) * jax.lax.rsqrt(var + LN_EPS) * gamma_ref[...] + beta_ref[...]
        return h

    def kernel(*refs):
        # ---- unpack refs (statically, order matches the wrapper) ------------
        row_ref, col_ref, x_ref, ea_ref = refs[0:4]
        i = 4
        w1a, w1b, b1 = refs[i], refs[i + 1], refs[i + 2]
        i += 3
        rest1 = [(refs[i + 2 * l], refs[i + 2 * l + 1]) for l in range(n_layers1 - 1)]
        i += 2 * (n_layers1 - 1)
        g1 = bt1 = None
        if ln:
            g1, bt1 = refs[i], refs[i + 1]
            i += 2
        w2a, w2b, b2 = refs[i], refs[i + 1], refs[i + 2]
        i += 3
        rest2 = [(refs[i + 2 * l], refs[i + 2 * l + 1]) for l in range(n_layers2 - 1)]
        i += 2 * (n_layers2 - 1)
        g2 = bt2 = None
        if ln:
            g2, bt2 = refs[i], refs[i + 1]
            i += 2
        out_ref, seg_ref, cnt_ref = refs[i], refs[i + 1], refs[i + 2]

        e = pl.program_id(0)
        last = pl.num_programs(0) - 1

        @pl.when(e == 0)
        def _init():
            seg_ref[...] = jnp.zeros_like(seg_ref)
            cnt_ref[...] = jnp.zeros_like(cnt_ref)

        N = x_ref.shape[0]
        Et = ea_ref.shape[0]
        x = x_ref[...]                                               # [N, x_size]

        # ---- gather x[row] via one-hot matmul on the MXU --------------------
        row = row_ref[...]                                           # [Et, 1] i32
        g_oh = (row == jax.lax.broadcasted_iota(jnp.int32, (Et, N), 1)
                ).astype(jnp.float32)                                # [Et, N]
        x_row = jnp.dot(g_oh, x, preferred_element_type=jnp.float32)  # [Et, x_size]

        # ---- MLP1: first-layer weight split fuses the concat into the matmul
        h = (jnp.dot(x_row, w1a[...], preferred_element_type=jnp.float32)
             + jnp.dot(ea_ref[...], w1b[...], preferred_element_type=jnp.float32)
             + b1[...])
        vals = mlp_tail(h, rest1, g1, bt1, n_layers1)                # [Et, F]

        # ---- scatter-mean accumulation --------------------------------------
        # One-hot built pre-transposed [N, Et] (no XLU transpose); counts come
        # off the MXU with a ones column vector (no XLU row reduction).
        # Out-of-range col indices (used for edge padding) match nothing and
        # are silently dropped.
        col = col_ref[...]                                           # [1, Et] i32
        s_oh = (jax.lax.broadcasted_iota(jnp.int32, (N, Et), 0) == col
                ).astype(jnp.float32)                                # [N, Et]
        seg_ref[...] += jnp.dot(s_oh, vals, preferred_element_type=jnp.float32)
        cnt_ref[...] += jnp.dot(s_oh, jnp.ones((Et, 1), jnp.float32),
                                preferred_element_type=jnp.float32)

        # ---- finalize on the last edge tile: normalize + MLP2 ----------------
        @pl.when(e == last)
        def _finish():
            cnt = jnp.maximum(cnt_ref[...], 1.0)
            inv = pl.reciprocal(cnt, approx=True)        # EUP slot (cheap)
            inv = inv * (2.0 - cnt * inv)                # one Newton step -> f32 accurate
            agg = seg_ref[...] * inv                                  # [N, F]
            h2 = (jnp.dot(x, w2a[...], preferred_element_type=jnp.float32)
                  + jnp.dot(agg, w2b[...], preferred_element_type=jnp.float32)
                  + b2[...])
            out = mlp_tail(h2, rest2, g2, bt2, n_layers2)
            out_ref[...] = out.astype(out_ref.dtype)

    return kernel


# ----------------------------------------------------------------------------
# Wrapper: builds args/specs and launches the single fused pallas_call
# ----------------------------------------------------------------------------
def node_model_forward(params, x, edge_index, edge_attr, u, batch,
                       activate_last=True, layer_norm=True, edge_tile=128):
    N, x_size = x.shape
    E, edge_dim = edge_attr.shape
    out_size = params["mlp1"]["ws"][-1].shape[1]
    n1 = len(params["mlp1"]["ws"])
    n2 = len(params["mlp2"]["ws"])
    ln = activate_last and layer_norm

    # Edge-dimension tiling (edge_tile must be a multiple of 128 for lane-legal
    # blocking of the [1, E] col vector). Pad: row -> 0 (harmless extra MLP1
    # rows), col -> N (out of range -> dropped by the one-hot), edge_attr -> 0.
    Et = edge_tile
    n_tiles = (E + Et - 1) // Et
    E_pad = n_tiles * Et
    pad = E_pad - E

    row = edge_index[0].astype(jnp.int32)
    col = edge_index[1].astype(jnp.int32)
    row_p = jnp.pad(row, (0, pad), constant_values=0).reshape(E_pad, 1)
    col_p = jnp.pad(col, (0, pad), constant_values=N).reshape(1, E_pad)
    ea_p = jnp.pad(edge_attr.astype(jnp.float32), ((0, pad), (0, 0)))

    args = [row_p, col_p, x.astype(jnp.float32), ea_p]
    specs = [
        pl.BlockSpec((Et, 1), lambda e: (e, 0)),
        pl.BlockSpec((1, Et), lambda e: (0, e)),
        pl.BlockSpec((N, x_size), lambda e: (0, 0)),
        pl.BlockSpec((Et, edge_dim), lambda e: (e, 0)),
    ]

    def add_full(a):
        args.append(a)
        specs.append(pl.BlockSpec(a.shape, lambda e: (0, 0)))

    # MLP1 params (first-layer weight split into x-part / edge_attr-part)
    m1 = params["mlp1"]
    w0 = m1["ws"][0]
    add_full(w0[:x_size])
    add_full(w0[x_size:])
    add_full(m1["bs"][0])
    for w, b in zip(m1["ws"][1:], m1["bs"][1:]):
        add_full(w)
        add_full(b)
    if ln:
        add_full(m1["gamma"])
        add_full(m1["beta"])

    # MLP2 params (first-layer weight split into x-part / aggregated-part)
    m2 = params["mlp2"]
    v0 = m2["ws"][0]
    add_full(v0[:x_size])
    add_full(v0[x_size:])
    add_full(m2["bs"][0])
    for w, b in zip(m2["ws"][1:], m2["bs"][1:]):
        add_full(w)
        add_full(b)
    if ln:
        add_full(m2["gamma"])
        add_full(m2["beta"])

    kernel = make_fused_kernel(n1, n2, activate_last, layer_norm)

    return pl.pallas_call(
        kernel,
        out_shape=jax.ShapeDtypeStruct((N, out_size), jnp.float32),
        grid=(n_tiles,),
        in_specs=specs,
        out_specs=pl.BlockSpec((N, out_size), lambda e: (0, 0)),
        scratch_shapes=[pltpu.VMEM((N, out_size), jnp.float32),   # segment sum
                        pltpu.VMEM((N, 1), jnp.float32)],         # segment count
        compiler_params=pltpu.CompilerParams(
            dimension_semantics=("arbitrary",)),                  # accumulation axis
    )(*args)


# ----------------------------------------------------------------------------
# Deterministic parameter init (synthetic, matches CreateMLP shapes)
# ----------------------------------------------------------------------------
def init_mlp(key, in_size, out_size, n_hidden, hidden_size, layer_norm_last):
    dims = [in_size] + [hidden_size] * n_hidden + [out_size]
    ws, bs = [], []
    for i in range(len(dims) - 1):
        key, k1, k2 = jax.random.split(key, 3)
        ws.append(0.1 * jax.random.normal(k1, (dims[i], dims[i + 1]), jnp.float32))
        bs.append(0.1 * jax.random.normal(k2, (1, dims[i + 1]), jnp.float32))
    p = {"ws": ws, "bs": bs}
    if layer_norm_last:
        p["gamma"] = jnp.ones((1, out_size), jnp.float32)   # LayerNorm default init
        p["beta"] = jnp.zeros((1, out_size), jnp.float32)
    return p, key


# ----------------------------------------------------------------------------
# Pure-JAX reference for correctness check
# ----------------------------------------------------------------------------
def ref_mlp(h, p, activate_last, layer_norm):
    n = len(p["ws"])
    for i, (w, b) in enumerate(zip(p["ws"], p["bs"])):
        h = h @ w + b
        if i < n - 1 or activate_last:
            h = jnp.where(h > 0, h, LEAKY_SLOPE * h)
    if activate_last and layer_norm:
        mu = h.mean(-1, keepdims=True)
        var = ((h - mu) ** 2).mean(-1, keepdims=True)
        h = (h - mu) / jnp.sqrt(var + LN_EPS) * p["gamma"] + p["beta"]
    return h


def ref_forward(params, x, edge_index, edge_attr, activate_last=True, layer_norm=True):
    row, col = edge_index[0], edge_index[1]
    N = x.shape[0]
    out = jnp.concatenate([x[row], edge_attr], axis=1)
    out = ref_mlp(out, params["mlp1"], activate_last, layer_norm)
    seg = jax.ops.segment_sum(out, col, num_segments=N)
    cnt = jax.ops.segment_sum(jnp.ones((out.shape[0], 1), jnp.float32), col,
                              num_segments=N)
    out = seg / jnp.maximum(cnt, 1.0)
    out = jnp.concatenate([x, out], axis=1)
    return ref_mlp(out, params["mlp2"], activate_last, layer_norm)


# ----------------------------------------------------------------------------
if __name__ == "__main__":
    # Small synthetic sizes consistent with NodeModel's forward:
    #   x_size=8, edge_attr dim=8 -> MLP1 in_size=16, out=16, 2 hidden of 32,
    #   LeakyReLU, activate_last=True, layer_norm=True.
    #   E=300 edges with edge_tile=128 -> 3 grid steps (exercises padding +
    #   the accumulate-then-finalize path).
    N, E = 64, 300
    x_size, edge_dim = 8, 8
    in_size = x_size + edge_dim
    out_size, n_hidden, hidden_size = 16, 2, 32
    activate_last, layer_norm = True, True

    key = jax.random.PRNGKey(0)
    mlp1, key = init_mlp(key, in_size, out_size, n_hidden, hidden_size, layer_norm)
    mlp2, key = init_mlp(key, x_size + out_size, out_size, n_hidden, hidden_size,
                         layer_norm)
    params = {"mlp1": mlp1, "mlp2": mlp2}

    key, kx, ke, kr, kc = jax.random.split(key, 5)
    x = jax.random.normal(kx, (N, x_size), jnp.float32)
    edge_attr = jax.random.normal(ke, (E, edge_dim), jnp.float32)
    row = jax.random.randint(kr, (E,), 0, N, dtype=jnp.int32)
    col = jax.random.randint(kc, (E,), 0, N, dtype=jnp.int32)
    edge_index = jnp.stack([row, col], axis=0)                  # [2, E]
    u = jnp.zeros((1, 4), jnp.float32)                          # unused in forward
    batch = jnp.zeros((N,), jnp.int32)                          # unused in forward

    out = node_model_forward(params, x, edge_index, edge_attr, u, batch,
                             activate_last, layer_norm, edge_tile=128)
    out = jax.block_until_ready(out)

    expected = ref_forward(params, x, edge_index, edge_attr, activate_last,
                           layer_norm)
    assert out.shape == (N, out_size)
    assert jnp.allclose(out, expected, atol=2e-4, rtol=2e-4), \
        "Pallas output mismatch vs JAX reference"

    print("KERNEL_OK")
</pallas_src>

<mosaic_0001>
module attributes {stable_mosaic.version = 11 : i64} {
  func.func @kernel(%arg0: i32, %arg1: memref<128x1xi32, #tpu.memory_space<vmem>>, %arg2: memref<1x128xi32, #tpu.memory_space<vmem>>, %arg3: memref<64x8xf32, #tpu.memory_space<vmem>>, %arg4: memref<128x8xf32, #tpu.memory_space<vmem>>, %arg5: memref<8x32xf32, #tpu.memory_space<vmem>>, %arg6: memref<8x32xf32, #tpu.memory_space<vmem>>, %arg7: memref<1x32xf32, #tpu.memory_space<vmem>>, %arg8: memref<32x32xf32, #tpu.memory_space<vmem>>, %arg9: memref<1x32xf32, #tpu.memory_space<vmem>>, %arg10: memref<32x16xf32, #tpu.memory_space<vmem>>, %arg11: memref<1x16xf32, #tpu.memory_space<vmem>>, %arg12: memref<1x16xf32, #tpu.memory_space<vmem>>, %arg13: memref<1x16xf32, #tpu.memory_space<vmem>>, %arg14: memref<8x32xf32, #tpu.memory_space<vmem>>, %arg15: memref<16x32xf32, #tpu.memory_space<vmem>>, %arg16: memref<1x32xf32, #tpu.memory_space<vmem>>, %arg17: memref<32x32xf32, #tpu.memory_space<vmem>>, %arg18: memref<1x32xf32, #tpu.memory_space<vmem>>, %arg19: memref<32x16xf32, #tpu.memory_space<vmem>>, %arg20: memref<1x16xf32, #tpu.memory_space<vmem>>, %arg21: memref<1x16xf32, #tpu.memory_space<vmem>>, %arg22: memref<1x16xf32, #tpu.memory_space<vmem>>, %arg23: memref<64x16xf32, #tpu.memory_space<vmem>>, %arg24: memref<64x16xf32, #tpu.memory_space<vmem>>, %arg25: memref<64x1xf32, #tpu.memory_space<vmem>>) attributes {dimension_semantics = [#tpu.dimension_semantics<arbitrary>], iteration_bounds = array<i64: 3>, scalar_prefetch = 0 : i64, scratch_operands = 2 : i64, tpu.core_type = #tpu.core_type<tc>, window_params = [{transform_indices = @transform_0, window_bounds = array<i64: 128, 1>}, {transform_indices = @transform_1, window_bounds = array<i64: 1, 128>}, {pipeline_mode = #tpu.pipeline_mode<synchronous>, transform_indices = @transform_2, window_bounds = array<i64: 64, 8>}, {transform_indices = @transform_3, window_bounds = array<i64: 128, 8>}, {pipeline_mode = #tpu.pipeline_mode<synchronous>, transform_indices = @transform_4, window_bounds = array<i64: 8, 32>}, {pipeline_mode = #tpu.pipeline_mode<synchronous>, transform_indices = @transform_5, window_bounds = array<i64: 8, 32>}, {pipeline_mode = #tpu.pipeline_mode<synchronous>, transform_indices = @transform_6, window_bounds = array<i64: 1, 32>}, {pipeline_mode = #tpu.pipeline_mode<synchronous>, transform_indices = @transform_7, window_bounds = array<i64: 32, 32>}, {pipeline_mode = #tpu.pipeline_mode<synchronous>, transform_indices = @transform_8, window_bounds = array<i64: 1, 32>}, {pipeline_mode = #tpu.pipeline_mode<synchronous>, transform_indices = @transform_9, window_bounds = array<i64: 32, 16>}, {pipeline_mode = #tpu.pipeline_mode<synchronous>, transform_indices = @transform_10, window_bounds = array<i64: 1, 16>}, {pipeline_mode = #tpu.pipeline_mode<synchronous>, transform_indices = @transform_11, window_bounds = array<i64: 1, 16>}, {pipeline_mode = #tpu.pipeline_mode<synchronous>, transform_indices = @transform_12, window_bounds = array<i64: 1, 16>}, {pipeline_mode = #tpu.pipeline_mode<synchronous>, transform_indices = @transform_13, window_bounds = array<i64: 8, 32>}, {pipeline_mode = #tpu.pipeline_mode<synchronous>, transform_indices = @transform_14, window_bounds = array<i64: 16, 32>}, {pipeline_mode = #tpu.pipeline_mode<synchronous>, transform_indices = @transform_15, window_bounds = array<i64: 1, 32>}, {pipeline_mode = #tpu.pipeline_mode<synchronous>, transform_indices = @transform_16, window_bounds = array<i64: 32, 32>}, {pipeline_mode = #tpu.pipeline_mode<synchronous>, transform_indices = @transform_17, window_bounds = array<i64: 1, 32>}, {pipeline_mode = #tpu.pipeline_mode<synchronous>, transform_indices = @transform_18, window_bounds = array<i64: 32, 16>}, {pipeline_mode = #tpu.pipeline_mode<synchronous>, transform_indices = @transform_19, window_bounds = array<i64: 1, 16>}, {pipeline_mode = #tpu.pipeline_mode<synchronous>, transform_indices = @transform_20, window_bounds = array<i64: 1, 16>}, {pipeline_mode = #tpu.pipeline_mode<synchronous>, transform_indices = @transform_21, window_bounds = array<i64: 1, 16>}, {pipeline_mode = #tpu.pipeline_mode<synchronous>, transform_indices = @transform_22, window_bounds = array<i64: 64, 16>}]} {
    %c0_i32 = arith.constant 0 : i32
    %0 = arith.cmpi eq, %arg0, %c0_i32 : i32
    %1 = arith.extui %0 : i1 to i32
    %c0_i32_0 = arith.constant 0 : i32
    %2 = arith.cmpi ne, %1, %c0_i32_0 : i32
    scf.if %2 {
      %cst_50 = arith.constant 0.000000e+00 : f32
      %81 = vector.broadcast %cst_50 : f32 to vector<64x16xf32>
      %c0_51 = arith.constant 0 : index
      %c0_52 = arith.constant 0 : index
      %82 = vector.load %arg24[%c0_51, %c0_52] : memref<64x16xf32, #tpu.memory_space<vmem>>, vector<64x16xf32>
      tpu.vector_store %arg24[%c0_51, %c0_52], %81 {strides = array<i32>} : memref<64x16xf32, #tpu.memory_space<vmem>>, vector<64x16xf32>,
      %cst_53 = arith.constant 0.000000e+00 : f32
      %83 = vector.broadcast %cst_53 : f32 to vector<64x1xf32>
      %c0_54 = arith.constant 0 : index
      %c0_55 = arith.constant 0 : index
      %84 = vector.load %arg25[%c0_54, %c0_55] : memref<64x1xf32, #tpu.memory_space<vmem>>, vector<64x1xf32>
      tpu.vector_store %arg25[%c0_54, %c0_55], %83 {strides = array<i32>} : memref<64x1xf32, #tpu.memory_space<vmem>>, vector<64x1xf32>,
    } else {
    }
    %c0 = arith.constant 0 : index
    %c0_1 = arith.constant 0 : index
    %3 = vector.load %arg3[%c0, %c0_1] : memref<64x8xf32, #tpu.memory_space<vmem>>, vector<64x8xf32>
    %c0_2 = arith.constant 0 : index
    %c0_3 = arith.constant 0 : index
    %4 = vector.load %arg1[%c0_2, %c0_3] : memref<128x1xi32, #tpu.memory_space<vmem>>, vector<128x1xi32>
    %5 = tpu.iota {dimensions = array<i32: 1>} : vector<128x64xi32>
    %6 = vector.broadcast %4 : vector<128x1xi32> to vector<128x64xi32>
    %7 = arith.cmpi eq, %6, %5 : vector<128x64xi32>
    %8 = arith.extui %7 : vector<128x64xi1> to vector<128x64xi32>
    %9 = arith.sitofp %8 : vector<128x64xi32> to vector<128x64xf32>
    %cst = arith.constant dense<0.000000e+00> : vector<128x8xf32>
    %10 = tpu.matmul %9, %3, %cst {dimension_numbers = #tpu.dot_dimension_numbers<[1], [0], [0], [1], [0, 0, 1, 1], [], []>} : vector<128x64xf32>, vector<64x8xf32>, vector<128x8xf32> -> vector<128x8xf32>
    %c0_4 = arith.constant 0 : index
    %c0_5 = arith.constant 0 : index
    %11 = vector.load %arg5[%c0_4, %c0_5] : memref<8x32xf32, #tpu.memory_space<vmem>>, vector<8x32xf32>
    %cst_6 = arith.constant dense<0.000000e+00> : vector<128x32xf32>
    %12 = tpu.matmul %10, %11, %cst_6 {dimension_numbers = #tpu.dot_dimension_numbers<[1], [0], [0], [1], [0, 0, 1, 1], [], []>} : vector<128x8xf32>, vector<8x32xf32>, vector<128x32xf32> -> vector<128x32xf32>
    %c0_7 = arith.constant 0 : index
    %c0_8 = arith.constant 0 : index
    %13 = vector.load %arg4[%c0_7, %c0_8] : memref<128x8xf32, #tpu.memory_space<vmem>>, vector<128x8xf32>
    %c0_9 = arith.constant 0 : index
    %c0_10 = arith.constant 0 : index
    %14 = vector.load %arg6[%c0_9, %c0_10] : memref<8x32xf32, #tpu.memory_space<vmem>>, vector<8x32xf32>
    %cst_11 = arith.constant dense<0.000000e+00> : vector<128x32xf32>
    %15 = tpu.matmul %13, %14, %cst_11 {dimension_numbers = #tpu.dot_dimension_numbers<[1], [0], [0], [1], [0, 0, 1, 1], [], []>} : vector<128x8xf32>, vector<8x32xf32>, vector<128x32xf32> -> vector<128x32xf32>
    %16 = arith.addf %12, %15 : vector<128x32xf32>
    %c0_12 = arith.constant 0 : index
    %c0_13 = arith.constant 0 : index
    %17 = vector.load %arg7[%c0_12, %c0_13] : memref<1x32xf32, #tpu.memory_space<vmem>>, vector<1x32xf32>
    %18 = vector.broadcast %17 : vector<1x32xf32> to vector<128x32xf32>
    %19 = arith.addf %16, %18 : vector<128x32xf32>
    %cst_14 = arith.constant 0.00999999977 : f32
    %20 = vector.broadcast %cst_14 : f32 to vector<128x32xf32>
    %21 = arith.mulf %20, %19 : vector<128x32xf32>
    %22 = arith.maximumf %19, %21 : vector<128x32xf32>
    %c0_15 = arith.constant 0 : index
    %c0_16 = arith.constant 0 : index
    %23 = vector.load %arg8[%c0_15, %c0_16] : memref<32x32xf32, #tpu.memory_space<vmem>>, vector<32x32xf32>
    %cst_17 = arith.constant dense<0.000000e+00> : vector<128x32xf32>
    %24 = tpu.matmul %22, %23, %cst_17 {dimension_numbers = #tpu.dot_dimension_numbers<[1], [0], [0], [1], [0, 0, 1, 1], [], []>} : vector<128x32xf32>, vector<32x32xf32>, vector<128x32xf32> -> vector<128x32xf32>
    %c0_18 = arith.constant 0 : index
    %c0_19 = arith.constant 0 : index
    %25 = vector.load %arg9[%c0_18, %c0_19] : memref<1x32xf32, #tpu.memory_space<vmem>>, vector<1x32xf32>
    %26 = vector.broadcast %25 : vector<1x32xf32> to vector<128x32xf32>
    %27 = arith.addf %24, %26 : vector<128x32xf32>
    %cst_20 = arith.constant 0.00999999977 : f32
    %28 = vector.broadcast %cst_20 : f32 to vector<128x32xf32>
    %29 = arith.mulf %28, %27 : vector<128x32xf32>
    %30 = arith.maximumf %27, %29 : vector<128x32xf32>
    %c0_21 = arith.constant 0 : index
    %c0_22 = arith.constant 0 : index
    %31 = vector.load %arg10[%c0_21, %c0_22] : memref<32x16xf32, #tpu.memory_space<vmem>>, vector<32x16xf32>
    %cst_23 = arith.constant dense<0.000000e+00> : vector<128x16xf32>
    %32 = tpu.matmul %30, %31, %cst_23 {dimension_numbers = #tpu.dot_dimension_numbers<[1], [0], [0], [1], [0, 0, 1, 1], [], []>} : vector<128x32xf32>, vector<32x16xf32>, vector<128x16xf32> -> vector<128x16xf32>
    %c0_24 = arith.constant 0 : index
    %c0_25 = arith.constant 0 : index
    %33 = vector.load %arg11[%c0_24, %c0_25] : memref<1x16xf32, #tpu.memory_space<vmem>>, vector<1x16xf32>
    %34 = vector.broadcast %33 : vector<1x16xf32> to vector<128x16xf32>
    %35 = arith.addf %32, %34 : vector<128x16xf32>
    %cst_26 = arith.constant 0.00999999977 : f32
    %36 = vector.broadcast %cst_26 : f32 to vector<128x16xf32>
    %37 = arith.mulf %36, %35 : vector<128x16xf32>
    %38 = arith.maximumf %35, %37 : vector<128x16xf32>
    %cst_27 = arith.constant dense<0.000000e+00> : vector<128xf32>
    %39 = vector.multi_reduction <add>, %38, %cst_27 [1] : vector<128x16xf32> to vector<128xf32>
    %40 = vector.shape_cast %39 : vector<128xf32> to vector<128x1xf32>
    %cst_28 = arith.constant 1.600000e+01 : f32
    %41 = vector.broadcast %cst_28 : f32 to vector<128x1xf32>
    %42 = arith.divf %40, %41 : vector<128x1xf32>
    %43 = vector.broadcast %42 : vector<128x1xf32> to vector<128x16xf32>
    %44 = arith.subf %38, %43 : vector<128x16xf32>
    %45 = arith.mulf %44, %44 : vector<128x16xf32>
    %cst_29 = arith.constant dense<0.000000e+00> : vector<128xf32>
    %46 = vector.multi_reduction <add>, %45, %cst_29 [1] : vector<128x16xf32> to vector<128xf32>
    %47 = vector.shape_cast %46 : vector<128xf32> to vector<128x1xf32>
    %cst_30 = arith.constant 1.600000e+01 : f32
    %48 = vector.broadcast %cst_30 : f32 to vector<128x1xf32>
    %49 = arith.divf %47, %48 : vector<128x1xf32>
    %50 = vector.broadcast %42 : vector<128x1xf32> to vector<128x16xf32>
    %51 = arith.subf %38, %50 : vector<128x16xf32>
    %cst_31 = arith.constant 9.99999974E-6 : f32
    %52 = vector.broadcast %cst_31 : f32 to vector<128x1xf32>
    %53 = arith.addf %49, %52 : vector<128x1xf32>
    %54 = math.rsqrt %53 : vector<128x1xf32>
    %55 = vector.broadcast %54 : vector<128x1xf32> to vector<128x16xf32>
    %56 = arith.mulf %51, %55 : vector<128x16xf32>
    %c0_32 = arith.constant 0 : index
    %c0_33 = arith.constant 0 : index
    %57 = vector.load %arg12[%c0_32, %c0_33] : memref<1x16xf32, #tpu.memory_space<vmem>>, vector<1x16xf32>
    %58 = vector.broadcast %57 : vector<1x16xf32> to vector<128x16xf32>
    %59 = arith.mulf %56, %58 : vector<128x16xf32>
    %c0_34 = arith.constant 0 : index
    %c0_35 = arith.constant 0 : index
    %60 = vector.load %arg13[%c0_34, %c0_35] : memref<1x16xf32, #tpu.memory_space<vmem>>, vector<1x16xf32>
    %61 = vector.broadcast %60 : vector<1x16xf32> to vector<128x16xf32>
    %62 = arith.addf %59, %61 : vector<128x16xf32>
    %c0_36 = arith.constant 0 : index
    %c0_37 = arith.constant 0 : index
    %63 = vector.load %arg2[%c0_36, %c0_37] : memref<1x128xi32, #tpu.memory_space<vmem>>, vector<1x128xi32>
    %64 = tpu.iota {dimensions = array<i32: 0>} : vector<64x128xi32>
    %65 = vector.broadcast %63 : vector<1x128xi32> to vector<64x128xi32>
    %66 = arith.cmpi eq, %64, %65 : vector<64x128xi32>
    %67 = arith.extui %66 : vector<64x128xi1> to vector<64x128xi32>
    %68 = arith.sitofp %67 : vector<64x128xi32> to vector<64x128xf32>
    %c0_38 = arith.constant 0 : index
    %c0_39 = arith.constant 0 : index
    %69 = vector.load %arg24[%c0_38, %c0_39] : memref<64x16xf32, #tpu.memory_space<vmem>>, vector<64x16xf32>
    %cst_40 = arith.constant dense<0.000000e+00> : vector<64x16xf32>
    %70 = tpu.matmul %68, %62, %cst_40 {dimension_numbers = #tpu.dot_dimension_numbers<[1], [0], [0], [1], [0, 0, 1, 1], [], []>} : vector<64x128xf32>, vector<128x16xf32>, vector<64x16xf32> -> vector<64x16xf32>
    %71 = arith.addf %69, %70 : vector<64x16xf32>
    %c0_41 = arith.constant 0 : index
    %c0_42 = arith.constant 0 : index
    %72 = vector.load %arg24[%c0_41, %c0_42] : memref<64x16xf32, #tpu.memory_space<vmem>>, vector<64x16xf32>
    tpu.vector_store %arg24[%c0_41, %c0_42], %71 {strides = array<i32>} : memref<64x16xf32, #tpu.memory_space<vmem>>, vector<64x16xf32>,
    %c0_43 = arith.constant 0 : index
    %c0_44 = arith.constant 0 : index
    %73 = vector.load %arg25[%c0_43, %c0_44] : memref<64x1xf32, #tpu.memory_space<vmem>>, vector<64x1xf32>
    %cst_45 = arith.constant 1.000000e+00 : f32
    %74 = vector.broadcast %cst_45 : f32 to vector<128x1xf32>
    %cst_46 = arith.constant dense<0.000000e+00> : vector<64x1xf32>
    %75 = tpu.matmul %68, %74, %cst_46 {dimension_numbers = #tpu.dot_dimension_numbers<[1], [0], [0], [1], [0, 0, 1, 1], [], []>} : vector<64x128xf32>, vector<128x1xf32>, vector<64x1xf32> -> vector<64x1xf32>
    %76 = arith.addf %73, %75 : vector<64x1xf32>
    %c0_47 = arith.constant 0 : index
    %c0_48 = arith.constant 0 : index
    %77 = vector.load %arg25[%c0_47, %c0_48] : memref<64x1xf32, #tpu.memory_space<vmem>>, vector<64x1xf32>
    tpu.vector_store %arg25[%c0_47, %c0_48], %76 {strides = array<i32>} : memref<64x1xf32, #tpu.memory_space<vmem>>, vector<64x1xf32>,
    %c2_i32 = arith.constant 2 : i32
    %78 = arith.cmpi eq, %arg0, %c2_i32 : i32
    %79 = arith.extui %78 : i1 to i32
    %c0_i32_49 = arith.constant 0 : i32
    %80 = arith.cmpi ne, %79, %c0_i32_49 : i32
    scf.if %80 {
      %c0_50 = arith.constant 0 : index
      %c0_51 = arith.constant 0 : index
      %81 = vector.load %arg25[%c0_50, %c0_51] : memref<64x1xf32, #tpu.memory_space<vmem>>, vector<64x1xf32>
      %cst_52 = arith.constant 1.000000e+00 : f32
      %82 = vector.broadcast %cst_52 : f32 to vector<64x1xf32>
      %83 = arith.maximumf %81, %82 : vector<64x1xf32>
      %84 = tpu.reciprocal %83 {approx = true} : vector<64x1xf32> -> vector<64x1xf32>
      %85 = arith.mulf %83, %84 : vector<64x1xf32>
      %cst_53 = arith.constant 2.000000e+00 : f32
      %86 = vector.broadcast %cst_53 : f32 to vector<64x1xf32>
      %87 = arith.subf %86, %85 : vector<64x1xf32>
      %88 = arith.mulf %84, %87 : vector<64x1xf32>
      %c0_54 = arith.constant 0 : index
      %c0_55 = arith.constant 0 : index
      %89 = vector.load %arg24[%c0_54, %c0_55] : memref<64x16xf32, #tpu.memory_space<vmem>>, vector<64x16xf32>
      %90 = vector.broadcast %88 : vector<64x1xf32> to vector<64x16xf32>
      %91 = arith.mulf %89, %90 : vector<64x16xf32>
      %c0_56 = arith.constant 0 : index
      %c0_57 = arith.constant 0 : index
      %92 = vector.load %arg14[%c0_56, %c0_57] : memref<8x32xf32, #tpu.memory_space<vmem>>, vector<8x32xf32>
      %cst_58 = arith.constant dense<0.000000e+00> : vector<64x32xf32>
      %93 = tpu.matmul %3, %92, %cst_58 {dimension_numbers = #tpu.dot_dimension_numbers<[1], [0], [0], [1], [0, 0, 1, 1], [], []>} : vector<64x8xf32>, vector<8x32xf32>, vector<64x32xf32> -> vector<64x32xf32>
      %c0_59 = arith.constant 0 : index
      %c0_60 = arith.constant 0 : index
      %94 = vector.load %arg15[%c0_59, %c0_60] : memref<16x32xf32, #tpu.memory_space<vmem>>, vector<16x32xf32>
      %cst_61 = arith.constant dense<0.000000e+00> : vector<64x32xf32>
      %95 = tpu.matmul %91, %94, %cst_61 {dimension_numbers = #tpu.dot_dimension_numbers<[1], [0], [0], [1], [0, 0, 1, 1], [], []>} : vector<64x16xf32>, vector<16x32xf32>, vector<64x32xf32> -> vector<64x32xf32>
      %96 = arith.addf %93, %95 : vector<64x32xf32>
      %c0_62 = arith.constant 0 : index
      %c0_63 = arith.constant 0 : index
      %97 = vector.load %arg16[%c0_62, %c0_63] : memref<1x32xf32, #tpu.memory_space<vmem>>, vector<1x32xf32>
      %98 = vector.broadcast %97 : vector<1x32xf32> to vector<64x32xf32>
      %99 = arith.addf %96, %98 : vector<64x32xf32>
      %cst_64 = arith.constant 0.00999999977 : f32
      %100 = vector.broadcast %cst_64 : f32 to vector<64x32xf32>
      %101 = arith.mulf %100, %99 : vector<64x32xf32>
      %102 = arith.maximumf %99, %101 : vector<64x32xf32>
      %c0_65 = arith.constant 0 : index
      %c0_66 = arith.constant 0 : index
      %103 = vector.load %arg17[%c0_65, %c0_66] : memref<32x32xf32, #tpu.memory_space<vmem>>, vector<32x32xf32>
      %cst_67 = arith.constant dense<0.000000e+00> : vector<64x32xf32>
      %104 = tpu.matmul %102, %103, %cst_67 {dimension_numbers = #tpu.dot_dimension_numbers<[1], [0], [0], [1], [0, 0, 1, 1], [], []>} : vector<64x32xf32>, vector<32x32xf32>, vector<64x32xf32> -> vector<64x32xf32>
      %c0_68 = arith.constant 0 : index
      %c0_69 = arith.constant 0 : index
      %105 = vector.load %arg18[%c0_68, %c0_69] : memref<1x32xf32, #tpu.memory_space<vmem>>, vector<1x32xf32>
      %106 = vector.broadcast %105 : vector<1x32xf32> to vector<64x32xf32>
      %107 = arith.addf %104, %106 : vector<64x32xf32>
      %cst_70 = arith.constant 0.00999999977 : f32
      %108 = vector.broadcast %cst_70 : f32 to vector<64x32xf32>
      %109 = arith.mulf %108, %107 : vector<64x32xf32>
      %110 = arith.maximumf %107, %109 : vector<64x32xf32>
      %c0_71 = arith.constant 0 : index
      %c0_72 = arith.constant 0 : index
      %111 = vector.load %arg19[%c0_71, %c0_72] : memref<32x16xf32, #tpu.memory_space<vmem>>, vector<32x16xf32>
      %cst_73 = arith.constant dense<0.000000e+00> : vector<64x16xf32>
      %112 = tpu.matmul %110, %111, %cst_73 {dimension_numbers = #tpu.dot_dimension_numbers<[1], [0], [0], [1], [0, 0, 1, 1], [], []>} : vector<64x32xf32>, vector<32x16xf32>, vector<64x16xf32> -> vector<64x16xf32>
      %c0_74 = arith.constant 0 : index
      %c0_75 = arith.constant 0 : index
      %113 = vector.load %arg20[%c0_74, %c0_75] : memref<1x16xf32, #tpu.memory_space<vmem>>, vector<1x16xf32>
      %114 = vector.broadcast %113 : vector<1x16xf32> to vector<64x16xf32>
      %115 = arith.addf %112, %114 : vector<64x16xf32>
      %cst_76 = arith.constant 0.00999999977 : f32
      %116 = vector.broadcast %cst_76 : f32 to vector<64x16xf32>
      %117 = arith.mulf %116, %115 : vector<64x16xf32>
      %118 = arith.maximumf %115, %117 : vector<64x16xf32>
      %cst_77 = arith.constant dense<0.000000e+00> : vector<64xf32>
      %119 = vector.multi_reduction <add>, %118, %cst_77 [1] : vector<64x16xf32> to vector<64xf32>
      %120 = vector.shape_cast %119 : vector<64xf32> to vector<64x1xf32>
      %cst_78 = arith.constant 1.600000e+01 : f32
      %121 = vector.broadcast %cst_78 : f32 to vector<64x1xf32>
      %122 = arith.divf %120, %121 : vector<64x1xf32>
      %123 = vector.broadcast %122 : vector<64x1xf32> to vector<64x16xf32>
      %124 = arith.subf %118, %123 : vector<64x16xf32>
      %125 = arith.mulf %124, %124 : vector<64x16xf32>
      %cst_79 = arith.constant dense<0.000000e+00> : vector<64xf32>
      %126 = vector.multi_reduction <add>, %125, %cst_79 [1] : vector<64x16xf32> to vector<64xf32>
      %127 = vector.shape_cast %126 : vector<64xf32> to vector<64x1xf32>
      %cst_80 = arith.constant 1.600000e+01 : f32
      %128 = vector.broadcast %cst_80 : f32 to vector<64x1xf32>
      %129 = arith.divf %127, %128 : vector<64x1xf32>
      %130 = vector.broadcast %122 : vector<64x1xf32> to vector<64x16xf32>
      %131 = arith.subf %118, %130 : vector<64x16xf32>
      %cst_81 = arith.constant 9.99999974E-6 : f32
      %132 = vector.broadcast %cst_81 : f32 to vector<64x1xf32>
      %133 = arith.addf %129, %132 : vector<64x1xf32>
      %134 = math.rsqrt %133 : vector<64x1xf32>
      %135 = vector.broadcast %134 : vector<64x1xf32> to vector<64x16xf32>
      %136 = arith.mulf %131, %135 : vector<64x16xf32>
      %c0_82 = arith.constant 0 : index
      %c0_83 = arith.constant 0 : index
      %137 = vector.load %arg21[%c0_82, %c0_83] : memref<1x16xf32, #tpu.memory_space<vmem>>, vector<1x16xf32>
      %138 = vector.broadcast %137 : vector<1x16xf32> to vector<64x16xf32>
      %139 = arith.mulf %136, %138 : vector<64x16xf32>
      %c0_84 = arith.constant 0 : index
      %c0_85 = arith.constant 0 : index
      %140 = vector.load %arg22[%c0_84, %c0_85] : memref<1x16xf32, #tpu.memory_space<vmem>>, vector<1x16xf32>
      %141 = vector.broadcast %140 : vector<1x16xf32> to vector<64x16xf32>
      %142 = arith.addf %139, %141 : vector<64x16xf32>
      %c0_86 = arith.constant 0 : index
      %c0_87 = arith.constant 0 : index
      %143 = vector.load %arg23[%c0_86, %c0_87] : memref<64x16xf32, #tpu.memory_space<vmem>>, vector<64x16xf32>
      tpu.vector_store %arg23[%c0_86, %c0_87], %142 {strides = array<i32>} : memref<64x16xf32, #tpu.memory_space<vmem>>, vector<64x16xf32>,
    } else {
    }
    return
  }
  func.func @transform_0(%arg0: i32) -> (i32, i32) {
    %c0_i32 = arith.constant 0 : i32
    %c0_i32_0 = arith.constant 0 : i32
    return %arg0, %c0_i32 : i32, i32
  }
  func.func @transform_1(%arg0: i32) -> (i32, i32) {
    %c0_i32 = arith.constant 0 : i32
    %c0_i32_0 = arith.constant 0 : i32
    return %c0_i32, %arg0 : i32, i32
  }
  func.func @transform_2(%arg0: i32) -> (i32, i32) {
    %c0_i32 = arith.constant 0 : i32
    %c0_i32_0 = arith.constant 0 : i32
    %c0_i32_1 = arith.constant 0 : i32
    return %c0_i32, %c0_i32_0 : i32, i32
  }
  func.func @transform_3(%arg0: i32) -> (i32, i32) {
    %c0_i32 = arith.constant 0 : i32
    %c0_i32_0 = arith.constant 0 : i32
    return %arg0, %c0_i32 : i32, i32
  }
  func.func @transform_4(%arg0: i32) -> (i32, i32) {
    %c0_i32 = arith.constant 0 : i32
    %c0_i32_0 = arith.constant 0 : i32
    %c0_i32_1 = arith.constant 0 : i32
    return %c0_i32, %c0_i32_0 : i32, i32
  }
  func.func @transform_5(%arg0: i32) -> (i32, i32) {
    %c0_i32 = arith.constant 0 : i32
    %c0_i32_0 = arith.constant 0 : i32
    %c0_i32_1 = arith.constant 0 : i32
    return %c0_i32, %c0_i32_0 : i32, i32
  }
  func.func @transform_6(%arg0: i32) -> (i32, i32) {
    %c0_i32 = arith.constant 0 : i32
    %c0_i32_0 = arith.constant 0 : i32
    %c0_i32_1 = arith.constant 0 : i32
    return %c0_i32, %c0_i32_0 : i32, i32
  }
  func.func @transform_7(%arg0: i32) -> (i32, i32) {
    %c0_i32 = arith.constant 0 : i32
    %c0_i32_0 = arith.constant 0 : i32
    %c0_i32_1 = arith.constant 0 : i32
    return %c0_i32, %c0_i32_0 : i32, i32
  }
  func.func @transform_8(%arg0: i32) -> (i32, i32) {
    %c0_i32 = arith.constant 0 : i32
    %c0_i32_0 = arith.constant 0 : i32
    %c0_i32_1 = arith.constant 0 : i32
    return %c0_i32, %c0_i32_0 : i32, i32
  }
  func.func @transform_9(%arg0: i32) -> (i32, i32) {
    %c0_i32 = arith.constant 0 : i32
    %c0_i32_0 = arith.constant 0 : i32
    %c0_i32_1 = arith.constant 0 : i32
    return %c0_i32, %c0_i32_0 : i32, i32
  }
  func.func @transform_10(%arg0: i32) -> (i32, i32) {
    %c0_i32 = arith.constant 0 : i32
    %c0_i32_0 = arith.constant 0 : i32
    %c0_i32_1 = arith.constant 0 : i32
    return %c0_i32, %c0_i32_0 : i32, i32
  }
  func.func @transform_11(%arg0: i32) -> (i32, i32) {
    %c0_i32 = arith.constant 0 : i32
    %c0_i32_0 = arith.constant 0 : i32
    %c0_i32_1 = arith.constant 0 : i32
    return %c0_i32, %c0_i32_0 : i32, i32
  }
  func.func @transform_12(%arg0: i32) -> (i32, i32) {
    %c0_i32 = arith.constant 0 : i32
    %c0_i32_0 = arith.constant 0 : i32
    %c0_i32_1 = arith.constant 0 : i32
    return %c0_i32, %c0_i32_0 : i32, i32
  }
  func.func @transform_13(%arg0: i32) -> (i32, i32) {
    %c0_i32 = arith.constant 0 : i32
    %c0_i32_0 = arith.constant 0 : i32
    %c0_i32_1 = arith.constant 0 : i32
    return %c0_i32, %c0_i32_0 : i32, i32
  }
  func.func @transform_14(%arg0: i32) -> (i32, i32) {
    %c0_i32 = arith.constant 0 : i32
    %c0_i32_0 = arith.constant 0 : i32
    %c0_i32_1 = arith.constant 0 : i32
    return %c0_i32, %c0_i32_0 : i32, i32
  }
  func.func @transform_15(%arg0: i32) -> (i32, i32) {
    %c0_i32 = arith.constant 0 : i32
    %c0_i32_0 = arith.constant 0 : i32
    %c0_i32_1 = arith.constant 0 : i32
    return %c0_i32, %c0_i32_0 : i32, i32
  }
  func.func @transform_16(%arg0: i32) -> (i32, i32) {
    %c0_i32 = arith.constant 0 : i32
    %c0_i32_0 = arith.constant 0 : i32
    %c0_i32_1 = arith.constant 0 : i32
    return %c0_i32, %c0_i32_0 : i32, i32
  }
  func.func @transform_17(%arg0: i32) -> (i32, i32) {
    %c0_i32 = arith.constant 0 : i32
    %c0_i32_0 = arith.constant 0 : i32
    %c0_i32_1 = arith.constant 0 : i32
    return %c0_i32, %c0_i32_0 : i32, i32
  }
  func.func @transform_18(%arg0: i32) -> (i32, i32) {
    %c0_i32 = arith.constant 0 : i32
    %c0_i32_0 = arith.constant 0 : i32
    %c0_i32_1 = arith.constant 0 : i32
    return %c0_i32, %c0_i32_0 : i32, i32
  }
  func.func @transform_19(%arg0: i32) -> (i32, i32) {
    %c0_i32 = arith.constant 0 : i32
    %c0_i32_0 = arith.constant 0 : i32
    %c0_i32_1 = arith.constant 0 : i32
    return %c0_i32, %c0_i32_0 : i32, i32
  }
  func.func @transform_20(%arg0: i32) -> (i32, i32) {
    %c0_i32 = arith.constant 0 : i32
    %c0_i32_0 = arith.constant 0 : i32
    %c0_i32_1 = arith.constant 0 : i32
    return %c0_i32, %c0_i32_0 : i32, i32
  }
  func.func @transform_21(%arg0: i32) -> (i32, i32) {
    %c0_i32 = arith.constant 0 : i32
    %c0_i32_0 = arith.constant 0 : i32
    %c0_i32_1 = arith.constant 0 : i32
    return %c0_i32, %c0_i32_0 : i32, i32
  }
  func.func @transform_22(%arg0: i32) -> (i32, i32) {
    %c0_i32 = arith.constant 0 : i32
    %c0_i32_0 = arith.constant 0 : i32
    %c0_i32_1 = arith.constant 0 : i32
    return %c0_i32, %c0_i32_0 : i32, i32
  }
}

</mosaic_0001>

<bundles_post_ra>
// kernel: tpu_custom_call.1
= control target key start
LH: loop header
LB: loop body
LE: loop exit
PB: predicated region body
PF: predicated region fallthrough
CT: control target
= control target key end

     0   :  { %s5268_s0 = inlined_call_operand.vmem [shape: s32[384,1], index: 0, kind: input, shape index: {}]   ;;  %s5269_s1 = inlined_call_operand.vmem [shape: s32[1,384], index: 1, kind: input, shape index: {}]   ;;  %s5270_s2 = inlined_call_operand.vmem [shape: f32[64,8], index: 2, kind: input, shape index: {}]   ;;  %s5271_s3 = inlined_call_operand.vmem [shape: f32[384,8], index: 3, kind: input, shape index: {}]   ;;  %s5272_s4 = inlined_call_operand.vmem [shape: f32[8,32], index: 4, kind: input, shape index: {}]   ;;  %s5273_s5 = inlined_call_operand.vmem [shape: f32[8,32], index: 5, kind: input, shape index: {}]   ;;  %s5274_s6 = inlined_call_operand.vmem [shape: f32[1,32], index: 6, kind: input, shape index: {}]   ;;  %s5275_s7 = inlined_call_operand.vmem [shape: f32[32,32], index: 7, kind: input, shape index: {}]   ;;  %s5276_s8 = inlined_call_operand.vmem [shape: f32[1,32], index: 8, kind: input, shape index: {}]   ;;  %s5277_s9 = inlined_call_operand.vmem [shape: f32[32,16], index: 9, kind: input, shape index: {}]   ;;  %s5278_s10 = inlined_call_operand.vmem [shape: f32[1,16], index: 10, kind: input, shape index: {}]   ;;  %s5279_s11 = inlined_call_operand.vmem [shape: f32[1,16], index: 11, kind: input, shape index: {}]   ;;  %s5280_s12 = inlined_call_operand.vmem [shape: f32[1,16], index: 12, kind: input, shape index: {}]   ;;  %s5281_s13 = inlined_call_operand.vmem [shape: f32[8,32], index: 13, kind: input, shape index: {}]   ;;  %s5282_s14 = inlined_call_operand.vmem [shape: f32[16,32], index: 14, kind: input, shape index: {}]   ;;  %s5283_s15 = inlined_call_operand.vmem [shape: f32[1,32], index: 15, kind: input, shape index: {}]   ;;  %s5284_s16 = inlined_call_operand.vmem [shape: f32[32,32], index: 16, kind: input, shape index: {}]   ;;  %s5285_s17 = inlined_call_operand.vmem [shape: f32[1,32], index: 17, kind: input, shape index: {}]   ;;  %s5286_s18 = inlined_call_operand.vmem [shape: f32[32,16], index: 18, kind: input, shape index: {}]   ;;  %s5287_s19 = inlined_call_operand.vmem [shape: f32[1,16], index: 19, kind: input, shape index: {}]   ;;  %s5288_s20 = inlined_call_operand.vmem [shape: f32[1,16], index: 20, kind: input, shape index: {}]   ;;  %s5289_s21 = inlined_call_operand.vmem [shape: f32[1,16], index: 21, kind: input, shape index: {}]   ;;  %s5290_s22 = inlined_call_operand.vmem [shape: f32[64,16], index: 22, kind: output, shape index: {}]  }
   0x1   :  { %5294 = sst [smem:[#allocation5_spill]] %s5268_s0 }
   0x2   :  { %5295 = sst [smem:[#allocation6_spill]] %s5269_s1 }
   0x3   :  { %5296 = sst [smem:[#allocation7_spill]] %s5270_s2 }
   0x4   :  { %5297 = sst [smem:[#allocation8_spill]] %s5271_s3  ;;  %s4449_s3 = smov 0  }
   0x5   :  { %5298 = sst [smem:[#allocation9_spill]] %s5272_s4 }
   0x6   :  { %5299 = sst [smem:[#allocation10_spill]] %s5273_s5 }
   0x7   :  { %5300 = sst [smem:[#allocation11_spill]] %s5274_s6 }
   0x8   :  { %5301 = sst [smem:[#allocation12_spill]] %s5290_s22 }
   0x9 LB: > { %5302 = sst [smem:[#allocation4_spill]] %s4326_s3  ;;  %s4455_s28 = sadd.s32 4294967295, %s4326_s3   ;;  %s4326_s3 = sphi %s4449_s3, %s32_s3  }
   0xa   : > { %p3437_p0 = scmp.ge.s32.totalorder %s4326_s3, 1  ;;  %p627_p1 = scmp.lt.s32.totalorder %s4326_s3, 4 }
   0xc   : > { %p628_p2 = pnand %p3437_p0, %p627_p1 }
   0xd   : > { %s3438_s29 = sshll.u32 (!%p628_p2), %s4455_s28, 4  ;;  %p698_p3 = scmp.lt.s32.totalorder (!%p628_p2), %s4455_s28, 2 }
   0xe   : > { %631 = sbr.rel (%p628_p2) target bundleno = 2750 (0xabe), region = 108  ;;  %p693_p4 = scmp.lt.s32.totalorder (!%p628_p2), %s3438_s29, 47 }
   0xf   : > { %s5303_s23 = sld [smem:[#allocation6_spill]] (!%p628_p2)  ;;  %s5304_s25 = sld [smem:[#allocation5_spill]] (!%p628_p2) }
  0x10   : > { %s5305_s3 = sld [smem:[#allocation8_spill]] (!%p628_p2)  ;;  %p3442_p5 = scmp.ne.s32.totalorder (!%p628_p2), %s4455_s28, 0 }
  0x15   : > { %s4462_s30 = scalar_select %p698_p3, %s4455_s28, 2 }
  0x16   : > { %s5314_s29 = smov (!%p693_p4, %s3438_s29), 47  ;;  %710 = sbr.rel (%p3442_p5) target bundleno = 32 (0x20), region = 112 }
  0x17   : > { %s700_s1 = scalar_lea.vmem %s5303_s23, %s4462_s30  ;;  %s3439_s5 = sshll.u32 %s5314_s29, 3  ;;  %vm711_vm0 = vcmask (!%p3442_p5), 130048   ;;  %vm720_vm1 = vcmask (!%p3442_p5), 7168   ;;  %v4328_v0 = vmov (!%p3442_p5), 0.0  }
  0x18   : > { %s4471_s26 = scalar_lea.vmem %s5304_s25, %s3439_s5  ;;  %s4476_s22 = scalar_lea.vmem %s5305_s3, %s3439_s5  ;;  %712 = vst.msk [vmem:[#allocation2] sm:$0xff] (!%p3442_p5), %vm711_vm0, %v4328_v0  ;;  %713 = vst.msk [vmem:[#allocation2 + $0x8] sm:$0xff] (!%p3442_p5), %vm711_vm0, %v4328_v0 }
  0x19   : > { %714 = vst.msk [vmem:[#allocation2 + $0x10] sm:$0xff] (!%p3442_p5), %vm711_vm0, %v4328_v0  ;;  %715 = vst.msk [vmem:[#allocation2 + $0x18] sm:$0xff] (!%p3442_p5), %vm711_vm0, %v4328_v0 }
  0x1a   : > { %716 = vst.msk [vmem:[#allocation2 + $0x20] sm:$0xff] (!%p3442_p5), %vm711_vm0, %v4328_v0  ;;  %717 = vst.msk [vmem:[#allocation2 + $0x28] sm:$0xff] (!%p3442_p5), %vm711_vm0, %v4328_v0 }
  0x1b   : > { %718 = vst.msk [vmem:[#allocation2 + $0x30] sm:$0xff] (!%p3442_p5), %vm711_vm0, %v4328_v0  ;;  %719 = vst.msk [vmem:[#allocation2 + $0x38] sm:$0xff] (!%p3442_p5), %vm711_vm0, %v4328_v0 }
  0x1c   : > { %721 = vst.msk [vmem:[#allocation3] sm:$0xff] (!%p3442_p5), %vm720_vm1, %v4328_v0  ;;  %722 = vst.msk [vmem:[#allocation3 + $0x8] sm:$0xff] (!%p3442_p5), %vm720_vm1, %v4328_v0 }
  0x1d   : > { %723 = vst.msk [vmem:[#allocation3 + $0x10] sm:$0xff] %vm720_vm1, %v4328_v0  ;;  %724 = vst.msk [vmem:[#allocation3 + $0x18] sm:$0xff] %vm720_vm1, %v4328_v0 }
  0x1e   : > { %725 = vst.msk [vmem:[#allocation3 + $0x20] sm:$0xff] %vm720_vm1, %v4328_v0  ;;  %726 = vst.msk [vmem:[#allocation3 + $0x28] sm:$0xff] %vm720_vm1, %v4328_v0 }
  0x1f   : > { %727 = vst.msk [vmem:[#allocation3 + $0x30] sm:$0xff] %vm720_vm1, %v4328_v0  ;;  %728 = vst.msk [vmem:[#allocation3 + $0x38] sm:$0xff] %vm720_vm1, %v4328_v0 }
  0x20 PF: > { %v739_v1 = vld [vmem:[%s4471_s26 + $0x10] sm:$0xff]  ;;  %v737_v2 = vld [vmem:[%s4471_s26] sm:$0xff]  ;;  %v4329_v3 = vmov 0   ;;  %v740_v4 = vld [vmem:[%s4471_s26 + $0x18] sm:$0xff]  ;;  %s5306_s4 = sld [smem:[#allocation7_spill]]  ;;  %s5307_s2 = sld [smem:[#allocation10_spill]]  ;;  %v753_v44 = vlaneseq }
  0x21   : > { %4253 = vset.pattern.permute.xlu1 %v4329_v3  ;;  %4252 = vset.pattern.permute.xlu0 %v4329_v3  ;;  %v738_v5 = vld [vmem:[%s4471_s26 + $0x8] sm:$0xff]  ;;  %v741_v12 = vld [vmem:[%s4471_s26 + $0x20] sm:$0xff]  ;;  %v744_v16 = vld [vmem:[%s4471_s26 + $0x38] sm:$0xff]  ;;  %vm1063_vm2 = vcmask 64512   ;;  %s5308_s29 = sld [smem:[#allocation9_spill]]  ;;  %vm851_vm3 = vcmask 523264  }
  0x22   : > { %762 = vperm.xlu1 %4253, %v739_v1   ;;  %756 = vperm.xlu0 %4252, %v737_v2   ;;  %v742_v11 = vld [vmem:[%s4471_s26 + $0x28] sm:$0xff]  ;;  %v743_v17 = vld [vmem:[%s4471_s26 + $0x30] sm:$0xff]  ;;  %v745_v22 = vld [vmem:[%s4471_s26 + $0x40] sm:$0xff]  ;;  %v4582_v45 = vand.u32 127, %v753_v44  ;;  %v4330_v48 = vmov 0.0   ;;  %s5309_s6 = sld [smem:[#allocation11_spill]] }
  0x23   : > { %v746_v21 = vld [vmem:[%s4471_s26 + $0x48] sm:$0xff]  ;;  %v748_v24 = vld [vmem:[%s4471_s26 + $0x58] sm:$0xff]  ;;  %v747_v25 = vld [vmem:[%s4471_s26 + $0x50] sm:$0xff]  ;;  %p3569_p6 = scmp.ne.s32.totalorder %s4455_s28, 2 }
  0x24   : > { %v750_v26 = vld [vmem:[%s4471_s26 + $0x68] sm:$0xff]  ;;  %v749_v27 = vld [vmem:[%s4471_s26 + $0x60] sm:$0xff]  ;;  %v752_v28 = vld [vmem:[%s4471_s26 + $0x78] sm:$0xff]  ;;  %s5311_s25 = sld [smem:[#allocation12_spill]] (!%p3569_p6) }
  0x25   : > { %v751_v29 = vld [vmem:[%s4471_s26 + $0x70] sm:$0xff]  ;;  %v1050_v31 = vld [vmem:[%s4476_s22 + $0x20] sm:$0xff]  ;;  %v1051_v32 = vld [vmem:[%s4476_s22 + $0x28] sm:$0xff] }
  0x26   : > { %v4494_v6 = vld [vmem:[%s5306_s4] sm:$0xff]  ;;  %v4499_v7 = vld [vmem:[%s5306_s4 + $0x8] sm:$0xff]  ;;  %765 = vperm.xlu1 %4253, %v740_v4   ;;  %759 = vperm.xlu0 %4252, %v738_v5   ;;  %v4506_v9 = vld [vmem:[%s5306_s4 + $0x10] sm:$0xff] }
  0x27   : > { %v4112_v8 = vpack.c.bf16 %v4499_v7, %v4494_v6  ;;  %v4511_v10 = vld [vmem:[%s5306_s4 + $0x18] sm:$0xff]  ;;  %v4520_v14 = vld [vmem:[%s5306_s4 + $0x20] sm:$0xff]  ;;  %v4525_v15 = vld [vmem:[%s5306_s4 + $0x28] sm:$0xff]  ;;  %3846 = vmatprep.mubr.msk.f32.mxu1 %vm1063_vm2, %v1050_v31 }
  0x28   : > { %v4116_v13 = vpack.c.bf16 %v4511_v10, %v4506_v9  ;;  %v4120_v18 = vpack.c.bf16 %v4525_v15, %v4520_v14  ;;  %v4534_v19 = vld [vmem:[%s5306_s4 + $0x30] sm:$0xff]  ;;  %v4539_v20 = vld [vmem:[%s5306_s4 + $0x38] sm:$0xff]  ;;  %v1062_v30 = vld [vmem:[%s5307_s2] sm:$0xff] }
  0x29   : > { %4113 = vmatprep.subr.bf16.mxu0 %v4112_v8  ;;  %v4124_v23 = vpack.c.bf16 %v4539_v20, %v4534_v19  ;;  %4212 = vmatprep.subr.mxu1 %v1062_v30  ;;  %v1045_v33 = vld [vmem:[%s5308_s29] sm:$0xff]  ;;  %v1052_v34 = vld [vmem:[%s4476_s22 + $0x30] sm:$0xff]  ;;  %v1053_v35 = vld [vmem:[%s4476_s22 + $0x38] sm:$0xff] }
  0x2a   : > { %4115 = vmatpush3.bf16.msra.mxu0 %v4112_v8  ;;  %771 = vperm.xlu1 %4253, %v742_v11   ;;  %v1054_v36 = vld [vmem:[%s4476_s22 + $0x40] sm:$0xff]  ;;  %v1055_v37 = vld [vmem:[%s4476_s22 + $0x48] sm:$0xff]  ;;  %v1056_v38 = vld [vmem:[%s4476_s22 + $0x50] sm:$0xff] }
  0x2b   : > { %768 = vperm.xlu0 %4252, %v741_v12   ;;  %4117 = vmatprep.subr.bf16.mxu0 %v4116_v13  ;;  %v1057_v39 = vld [vmem:[%s4476_s22 + $0x58] sm:$0xff]  ;;  %v1058_v40 = vld [vmem:[%s4476_s22 + $0x60] sm:$0xff]  ;;  %v1059_v41 = vld [vmem:[%s4476_s22 + $0x68] sm:$0xff] }
  0x2c   : > { %4213 = vmatpush3.msra.mxu1 %v1062_v30  ;;  %v1060_v42 = vld [vmem:[%s4476_s22 + $0x70] sm:$0xff]  ;;  %v1061_v43 = vld [vmem:[%s4476_s22 + $0x78] sm:$0xff] }
  0x2d   : > { %3847 = vmatmul.mubr.msk.f32.vlgmr.msra.gmra.mrb[0].mxu1 %vm1063_vm2, %v1051_v32  ;;  %3864 = vmatprep.subr.mxu1 %v1045_v33 }
  0x2e   : > { %4119 = vmatpush3.bf16.msra.mxu0 %v4116_v13  ;;  %777 = vperm.xlu1 %4253, %v744_v16  }
  0x2f   : > { %774 = vperm.xlu0 %4252, %v743_v17   ;;  %4121 = vmatprep.subr.bf16.mxu0 %v4120_v18 }
  0x30   : > { %3865 = vmatpush3.msra.mxu1 %v1045_v33  ;;  %3849 = vmatprep.mubr.msk.f32.mxu1 %vm1063_vm2, %v1052_v34 }
  0x31   : > { %3850 = vmatmul.mubr.msk.f32.gmra.mrb[2].mxu1 %vm1063_vm2, %v1053_v35 }
  0x32   : > { %4123 = vmatpush3.bf16.msra.mxu0 %v4120_v18  ;;  %783 = vperm.xlu1 %4253, %v746_v21  }
  0x33   : > { %780 = vperm.xlu0 %4252, %v745_v22   ;;  %4125 = vmatprep.subr.bf16.mxu0 %v4124_v23 }
  0x34   : > { %3852 = vmatprep.mubr.msk.f32.mxu1 %vm1063_vm2, %v1054_v36 }
  0x35   : > { %3853 = vmatmul.mubr.msk.f32.gmra.mrb[4].mxu1 %vm1063_vm2, %v1055_v37 }
  0x36   : > { %4127 = vmatpush3.bf16.msra.mxu0 %v4124_v23  ;;  %789 = vperm.xlu1 %4253, %v748_v24   ;;  %v1046_v23 = vld [vmem:[%s4476_s22] sm:$0xff]  ;;  %v1047_v24 = vld [vmem:[%s4476_s22 + $0x8] sm:$0xff] }
  0x37   : > { %786 = vperm.xlu0 %4252, %v747_v25   ;;  %3838 = vmatprep.subr.mxu0 %v1062_v30  ;;  %v1048_v25 = vld [vmem:[%s4476_s22 + $0x10] sm:$0xff] }
  0x38   : > { %3855 = vmatprep.mubr.msk.f32.mxu1 %vm1063_vm2, %v1056_v38 }
  0x39   : > { %3856 = vmatmul.mubr.msk.f32.gmra.mrb[6].mxu1 %vm1063_vm2, %v1057_v39 }
  0x3a   : > { %795 = vperm.xlu1 %4253, %v750_v26   ;;  %3858 = vmatprep.mubr.msk.f32.mxu1 %vm1063_vm2, %v1058_v40  ;;  %v1049_v26 = vld [vmem:[%s4476_s22 + $0x18] sm:$0xff] }
  0x3b   : > { %792 = vperm.xlu0 %4252, %v749_v27  }
  0x3d   : > { %3859 = vmatmul.mubr.msk.f32.gmra.mrb[8].mxu1 %vm1063_vm2, %v1059_v41 }
  0x3e   : > { %801 = vperm.xlu1 %4253, %v752_v28   ;;  %3861 = vmatprep.mubr.msk.f32.mxu1 %vm1063_vm2, %v1060_v42 }
  0x3f   : > { %798 = vperm.xlu0 %4252, %v751_v29  }
  0x41   : > { %3862 = vmatmul.mubr.msk.f32.gmra.mrb[10].mxu1 %vm1063_vm2, %v1061_v43 }
  0xa1   : > { %v763_v46 = vpop.permute.xlu1 %762  ;;  %v757_v47 = vpop.permute.xlu0 %756 }
  0xa2   : > { %vm803_vm4 = vcmp.eq.s32.totalorder %v757_v47, %v4582_v45  ;;  %vm805_vm5 = vcmp.eq.s32.totalorder %v763_v46, %v4582_v45  ;;  %v1505_v46 = vld [vmem:[%s5275_s7] sm:$0xff]  ;;  %v1506_v47 = vld [vmem:[%s5275_s7 + $0x8] sm:$0xff] }
  0xa3   : > { %v3443_v49 = vsel %vm803_vm4, 1.0, %v4330_v48  ;;  %v3445_v52 = vsel %vm805_vm5, 1.0, %v4330_v48 }
  0xa4   : > { %3814 = vmatprep.mubr.msk.f32.mxu0 %vm851_vm3, %v3443_v49 }
  0xa5   : > { %v766_v50 = vpop.permute.xlu1 %765  ;;  %v760_v51 = vpop.permute.xlu0 %759 }
  0xa6   : > { %vm804_vm6 = vcmp.eq.s32.totalorder %v760_v51, %v4582_v45  ;;  %vm806_vm7 = vcmp.eq.s32.totalorder %v766_v50, %v4582_v45  ;;  %v1507_v50 = vld [vmem:[%s5275_s7 + $0x10] sm:$0xff]  ;;  %v1508_v51 = vld [vmem:[%s5275_s7 + $0x18] sm:$0xff] }
  0xa7   : > { %v3444_v53 = vsel %vm804_vm6, 1.0, %v4330_v48  ;;  %v3446_v56 = vsel %vm806_vm7, 1.0, %v4330_v48  ;;  %vm1978_vm6 = vcmask 130048  }
  0xa8   : > { %3815 = vmatmul.mubr.msk.f32.vlgmr.msra.gmra.mrb[0].mxu0 %vm851_vm3, %v3444_v53  ;;  %v4132_v53 = vpack.c.bf16 %v1508_v51, %v1507_v50 }
  0xa9   : > { %v772_v54 = vpop.permute.xlu1 %771  ;;  %3817 = vmatprep.mubr.msk.f32.mxu0 %vm851_vm3, %v3445_v52  ;;  %3839 = vmatpush3.msra.mxu0 %v1062_v30 }
  0xaa   : > { %v769_v55 = vpop.permute.xlu0 %768  ;;  %vm808_vm9 = vcmp.eq.s32.totalorder %v772_v54, %v4582_v45  ;;  %v1742_v54 = vld [vmem:[%s5277_s9] sm:$0xff] }
  0xab   : > { %vm807_vm8 = vcmp.eq.s32.totalorder %v769_v55, %v4582_v45  ;;  %v3448_v60 = vsel %vm808_vm9, 1.0, %v4330_v48  ;;  %v1743_v55 = vld [vmem:[%s5277_s9 + $0x8] sm:$0xff] }
  0xac   : > { %v3447_v57 = vsel %vm807_vm8, 1.0, %v4330_v48  ;;  %3818 = vmatmul.mubr.msk.f32.gmra.mrb[2].mxu0 %vm851_vm3, %v3446_v56  ;;  %v1744_v56 = vld [vmem:[%s5277_s9 + $0x10] sm:$0xff] }
  0xad   : > { %v778_v58 = vpop.permute.xlu1 %777  ;;  %3820 = vmatprep.mubr.msk.f32.mxu0 %vm851_vm3, %v3447_v57  ;;  %v4136_v57 = vpack.c.bf16 %v1743_v55, %v1742_v54 }
  0xae   : > { %v775_v59 = vpop.permute.xlu0 %774  ;;  %vm810_vm11 = vcmp.eq.s32.totalorder %v778_v58, %v4582_v45  ;;  %v1745_v58 = vld [vmem:[%s5277_s9 + $0x18] sm:$0xff] }
  0xaf   : > { %vm809_vm10 = vcmp.eq.s32.totalorder %v775_v59, %v4582_v45  ;;  %v3450_v0 = vsel %vm810_vm11, 1.0, %v4330_v48  ;;  %v4140_v59 = vpack.c.bf16 %v1745_v58, %v1744_v56  ;;  %4137 = vmatprep.subr.bf16.mxu1 %v4136_v57 }
  0xb0   : > { %v3449_v61 = vsel %vm809_vm10, 1.0, %v4330_v48  ;;  %3821 = vmatmul.mubr.msk.f32.gmra.mrb[4].mxu0 %vm851_vm3, %v3448_v60 }
  0xb1   : > { %v784_v62 = vpop.permute.xlu1 %783  ;;  %3823 = vmatprep.mubr.msk.f32.mxu0 %vm851_vm3, %v3449_v61  ;;  %v4667_v61 = vld [vmem:[%s5309_s6] ss:$0 sm:$0xff] }
  0xb2   : > { %v781_v63 = vpop.permute.xlu0 %780  ;;  %vm812_vm13 = vcmp.eq.s32.totalorder %v784_v62, %v4582_v45 }
  0xb3   : > { %vm811_vm12 = vcmp.eq.s32.totalorder %v781_v63, %v4582_v45  ;;  %v3452_v4 = vsel %vm812_vm13, 1.0, %v4330_v48 }
  0xb4   : > { %v3451_v1 = vsel %vm811_vm12, 1.0, %v4330_v48  ;;  %3824 = vmatmul.mubr.msk.f32.gmra.mrb[6].mxu0 %vm851_vm3, %v3450_v0 }
  0xb5   : > { %v790_v2 = vpop.permute.xlu1 %789  ;;  %3826 = vmatprep.mubr.msk.f32.mxu0 %vm851_vm3, %v3451_v1 }
  0xb6   : > { %v787_v3 = vpop.permute.xlu0 %786  ;;  %vm814_vm15 = vcmp.eq.s32.totalorder %v790_v2, %v4582_v45 }
  0xb7   : > { %vm813_vm14 = vcmp.eq.s32.totalorder %v787_v3, %v4582_v45  ;;  %v3454_v12 = vsel %vm814_vm15, 1.0, %v4330_v48  ;;  %vm2522_vm15 = vcmask 7168  }
  0xb8   : > { %v3453_v5 = vsel %vm813_vm14, 1.0, %v4330_v48  ;;  %3827 = vmatmul.mubr.msk.f32.gmra.mrb[8].mxu0 %vm851_vm3, %v3452_v4 }
  0xb9   : > { %v796_v8 = vpop.permute.xlu1 %795  ;;  %3829 = vmatprep.mubr.msk.f32.mxu0 %vm851_vm3, %v3453_v5 }
  0xba   : > { %v793_v11 = vpop.permute.xlu0 %792  ;;  %vm816_vm1 = vcmp.eq.s32.totalorder %v796_v8, %v4582_v45 }
  0xbb   : > { %vm815_vm0 = vcmp.eq.s32.totalorder %v793_v11, %v4582_v45  ;;  %v3456_v18 = vsel %vm816_vm1, 1.0, %v4330_v48 }
  0xbc   : > { %v3455_v13 = vsel %vm815_vm0, 1.0, %v4330_v48  ;;  %3830 = vmatmul.mubr.msk.f32.gmra.mrb[10].mxu0 %vm851_vm3, %v3454_v12 }
  0xbd   : > { %v802_v16 = vpop.permute.xlu1 %801  ;;  %3832 = vmatprep.mubr.msk.f32.mxu0 %vm851_vm3, %v3455_v13 }
  0xbe   : > { %v799_v17 = vpop.permute.xlu0 %798  ;;  %vm818_vm5 = vcmp.eq.s32.totalorder %v802_v16, %v4582_v45 }
  0xbf   : > { %vm817_vm4 = vcmp.eq.s32.totalorder %v799_v17, %v4582_v45  ;;  %v3458_v22 = vsel %vm818_vm5, 1.0, %v4330_v48 }
  0xc0   : > { %v3457_v21 = vsel %vm817_vm4, 1.0, %v4330_v48  ;;  %3833 = vmatmul.mubr.msk.f32.gmra.mrb[12].mxu0 %vm851_vm3, %v3456_v18  ;;  %v4128_v48 = vpack.c.bf16 %v1506_v47, %v1505_v46 }
  0xc1   : > { %3835 = vmatprep.mubr.msk.f32.mxu0 %vm851_vm3, %v3457_v21 }
  0xc2   : > { %4129 = vmatprep.subr.bf16.mxu0 %v4128_v48 }
  0xc4   : > { %3836 = vmatmul.mubr.msk.f32.gmra.mrb[14].mxu0 %vm851_vm3, %v3458_v22  ;;  %vm1516_vm3 = vcmask 261120  }
  0xc5   : > { %3840 = vmatprep.mubr.msk.f32.mxu0 %vm1063_vm2, %v1046_v23 }
  0xc8   : > { %3841 = vmatmul.mubr.msk.f32.vlgmr.msra.gmra.mrb[16].mxu0 %vm1063_vm2, %v1047_v24 }
  0xc9   : > { %3843 = vmatprep.mubr.msk.f32.mxu0 %vm1063_vm2, %v1048_v25  ;;  %4131 = vmatpush3.bf16.msra.mxu0 %v4128_v48 }
  0xca   : > { %4133 = vmatprep.subr.bf16.mxu0 %v4132_v53 }
  0xcc   : > { %3844 = vmatmul.mubr.msk.f32.gmra.mrb[18].mxu0 %vm1063_vm2, %v1049_v26 }
  0xcd   : > { %4135 = vmatpush3.bf16.msra.mxu0 %v4132_v53 }
 0x17b   : > { %v3816_v27 = vpop.f32.mrb[0].mxu0 }
 0x17c   : > { %v966_v28 = vpop.f32.mrb[1].mxu0 }
 0x17d   : > { %3866 = vmatprep.mubr.msk.f32.mxu1 %vm1063_vm2, %v966_v28 }
 0x17e   : > { %3867 = vmatmul.mubr.msk.f32.vlgmr.msra.gmra.mrb[12].mxu1 %vm1063_vm2, %v3816_v27 }
 0x17f   : > { %v3819_v29 = vpop.f32.mrb[2].mxu0  ;;  %4139 = vmatpush3.bf16.msra.mxu1 %v4136_v57 }
 0x180   : > { %v976_v30 = vpop.f32.mrb[3].mxu0  ;;  %4141 = vmatprep.subr.bf16.mxu1 %v4140_v59 }
 0x181   : > { %3869 = vmatprep.mubr.msk.f32.mxu1 %vm1063_vm2, %v976_v30 }
 0x182   : > { %3870 = vmatmul.mubr.msk.f32.gmra.mrb[14].mxu1 %vm1063_vm2, %v3819_v29 }
 0x183   : > { %v3822_v31 = vpop.f32.mrb[4].mxu0  ;;  %4143 = vmatpush3.bf16.msra.mxu1 %v4140_v59 }
 0x184   : > { %v986_v32 = vpop.f32.mrb[5].mxu0 }
 0x185   : > { %3872 = vmatprep.mubr.msk.f32.mxu1 %vm1063_vm2, %v986_v32 }
 0x186   : > { %3873 = vmatmul.mubr.msk.f32.gmra.mrb[0].mxu1 %vm1063_vm2, %v3822_v31 }
 0x187   : > { %v3825_v33 = vpop.f32.mrb[6].mxu0 }
 0x188   : > { %v996_v34 = vpop.f32.mrb[7].mxu0 }
 0x189   : > { %3875 = vmatprep.mubr.msk.f32.mxu1 %vm1063_vm2, %v996_v34 }
 0x18a   : > { %3876 = vmatmul.mubr.msk.f32.gmra.mrb[2].mxu1 %vm1063_vm2, %v3825_v33 }
 0x18b   : > { %v3828_v35 = vpop.f32.mrb[8].mxu0 }
 0x18c   : > { %v1006_v36 = vpop.f32.mrb[9].mxu0 }
 0x18d   : > { %3878 = vmatprep.mubr.msk.f32.mxu1 %vm1063_vm2, %v1006_v36 }
 0x18e   : > { %3879 = vmatmul.mubr.msk.f32.gmra.mrb[4].mxu1 %vm1063_vm2, %v3828_v35 }
 0x18f   : > { %v3831_v37 = vpop.f32.mrb[10].mxu0 }
 0x190   : > { %v1016_v38 = vpop.f32.mrb[11].mxu0 }
 0x191   : > { %3881 = vmatprep.mubr.msk.f32.mxu1 %vm1063_vm2, %v1016_v38 }
 0x192   : > { %3882 = vmatmul.mubr.msk.f32.gmra.mrb[6].mxu1 %vm1063_vm2, %v3831_v37 }
 0x193   : > { %v3834_v39 = vpop.f32.mrb[12].mxu0 }
 0x194   : > { %v1026_v40 = vpop.f32.mrb[13].mxu0 }
 0x195   : > { %3884 = vmatprep.mubr.msk.f32.mxu1 %vm1063_vm2, %v1026_v40 }
 0x196   : > { %3885 = vmatmul.mubr.msk.f32.gmra.mrb[8].mxu1 %vm1063_vm2, %v3834_v39 }
 0x197   : > { %v3837_v41 = vpop.f32.mrb[14].mxu0 }
 0x198   : > { %v1036_v42 = vpop.f32.mrb[15].mxu0 }
 0x199   : > { %3887 = vmatprep.mubr.msk.f32.mxu1 %vm1063_vm2, %v1036_v42 }
 0x19a   : > { %3888 = vmatmul.mubr.msk.f32.gmra.mrb[10].mxu1 %vm1063_vm2, %v3837_v41 }
 0x19b   : > { %v3842_v43 = vpop.f32.mrb[16].mxu0 }
 0x19c   : > { %v1178_v45 = vpop.f32.mrb[17].mxu0 }
 0x19f   : > { %v3845_v49 = vpop.f32.mrb[18].mxu0 }
 0x1a0   : > { %v1188_v52 = vpop.f32.mrb[19].mxu0 }
 0x251   : > { %v3868_v60 = vpop.f32.mrb[12].mxu1 }
 0x252   : > { %v1377_v62 = vadd.f32 %v3868_v60, %v3842_v43  ;;  %v1371_v63 = vpop.f32.mrb[13].mxu1 }
 0x253   : > { %v1372_v0 = vadd.f32 %v1371_v63, %v1178_v45 }
 0x254   : > { %v1458_v1 = vadd.f32 %v4667_v61, %v1377_v62 }
 0x255   : > { %v1457_v2 = vadd.f32 %v4667_v61, %v1372_v0  ;;  %v3871_v3 = vpop.f32.mrb[14].mxu1 }
 0x256   : > { %v1474_v4 = vmul.f32 0.01, %v1458_v1  ;;  %v1387_v5 = vadd.f32 %v3871_v3, %v3845_v49  ;;  %v1381_v8 = vpop.f32.mrb[15].mxu1 }
 0x257   : > { %v1473_v11 = vmul.f32 0.01, %v1457_v2  ;;  %v1382_v12 = vadd.f32 %v1381_v8, %v1188_v52 }
 0x258   : > { %v1460_v13 = vadd.f32 %v4667_v61, %v1387_v5  ;;  %v1490_v21 = vmax.f32 %v1458_v1, %v1474_v4 }
 0x259   : > { %v1489_v16 = vmax.f32 %v1457_v2, %v1473_v11  ;;  %v1459_v17 = vadd.f32 %v4667_v61, %v1382_v12  ;;  %v3874_v18 = vpop.f32.mrb[0].mxu1 }
 0x25a   : > { %v1476_v22 = vmul.f32 0.01, %v1460_v13  ;;  %v1462_v23 = vadd.f32 %v3874_v18, %v4667_v61  ;;  %v1391_v24 = vpop.f32.mrb[1].mxu1 }
 0x25b   : > { %v1475_v25 = vmul.f32 0.01, %v1459_v17  ;;  %v1461_v26 = vadd.f32 %v4667_v61, %v1391_v24  ;;  %3898 = vmatprep.mubr.msk.f32.mxu0 %vm1516_vm3, %v1489_v16 }
 0x25c   : > { %3899 = vmatmul.mubr.msk.f32.vlgmr.msra.gmra.mrb[20].mxu0 %vm1516_vm3, %v1490_v21  ;;  %v1492_v30 = vmax.f32 %v1460_v13, %v1476_v22  ;;  %v1478_v31 = vmul.f32 0.01, %v1462_v23 }
 0x25d   : > { %v1491_v27 = vmax.f32 %v1459_v17, %v1475_v25  ;;  %v1477_v28 = vmul.f32 0.01, %v1461_v26  ;;  %v3877_v29 = vpop.f32.mrb[2].mxu1  ;;  %v4704_v17 = vld [vmem:[%s5276_s8] ss:$0 sm:$0xff] }
 0x25e   : > { %v1464_v32 = vadd.f32 %v3877_v29, %v4667_v61  ;;  %v1401_v33 = vpop.f32.mrb[3].mxu1  ;;  %v1494_v38 = vmax.f32 %v1462_v23, %v1478_v31 }
 0x25f   : > { %v1493_v34 = vmax.f32 %v1461_v26, %v1477_v28  ;;  %v1463_v35 = vadd.f32 %v4667_v61, %v1401_v33  ;;  %3901 = vmatprep.mubr.msk.f32.mxu0 %vm1516_vm3, %v1491_v27 }
 0x260   : > { %3902 = vmatmul.mubr.msk.f32.gmra.mrb[22].mxu0 %vm1516_vm3, %v1492_v30  ;;  %v1480_v39 = vmul.f32 0.01, %v1464_v32 }
 0x261   : > { %v1479_v36 = vmul.f32 0.01, %v1463_v35  ;;  %v3880_v37 = vpop.f32.mrb[4].mxu1  ;;  %3904 = vmatprep.mubr.msk.f32.mxu0 %vm1516_vm3, %v1493_v34 }
 0x262   : > { %v1466_v40 = vadd.f32 %v3880_v37, %v4667_v61  ;;  %v1411_v41 = vpop.f32.mrb[5].mxu1  ;;  %v1496_v47 = vmax.f32 %v1464_v32, %v1480_v39 }
 0x263   : > { %v1495_v42 = vmax.f32 %v1463_v35, %v1479_v36  ;;  %v1465_v43 = vadd.f32 %v4667_v61, %v1411_v41 }
 0x264   : > { %3905 = vmatmul.mubr.msk.f32.gmra.mrb[24].mxu0 %vm1516_vm3, %v1494_v38  ;;  %v1482_v48 = vmul.f32 0.01, %v1466_v40 }
 0x265   : > { %v1481_v45 = vmul.f32 0.01, %v1465_v43  ;;  %v3883_v46 = vpop.f32.mrb[6].mxu1  ;;  %3907 = vmatprep.mubr.msk.f32.mxu0 %vm1516_vm3, %v1495_v42 }
 0x266   : > { %v1468_v49 = vadd.f32 %v3883_v46, %v4667_v61  ;;  %v1421_v50 = vpop.f32.mrb[7].mxu1  ;;  %v1498_v55 = vmax.f32 %v1466_v40, %v1482_v48 }
 0x267   : > { %v1497_v51 = vmax.f32 %v1465_v43, %v1481_v45  ;;  %v1467_v52 = vadd.f32 %v4667_v61, %v1421_v50 }
 0x268   : > { %3908 = vmatmul.mubr.msk.f32.gmra.mrb[26].mxu0 %vm1516_vm3, %v1496_v47  ;;  %v1484_v56 = vmul.f32 0.01, %v1468_v49 }
 0x269   : > { %v1483_v53 = vmul.f32 0.01, %v1467_v52  ;;  %v3886_v54 = vpop.f32.mrb[8].mxu1  ;;  %3910 = vmatprep.mubr.msk.f32.mxu0 %vm1516_vm3, %v1497_v51 }
 0x26a   : > { %v1470_v57 = vadd.f32 %v3886_v54, %v4667_v61  ;;  %v1431_v58 = vpop.f32.mrb[9].mxu1  ;;  %v1500_v0 = vmax.f32 %v1468_v49, %v1484_v56 }
 0x26b   : > { %v1499_v59 = vmax.f32 %v1467_v52, %v1483_v53  ;;  %v1469_v60 = vadd.f32 %v4667_v61, %v1431_v58 }
 0x26c   : > { %3911 = vmatmul.mubr.msk.f32.gmra.mrb[28].mxu0 %vm1516_vm3, %v1498_v55  ;;  %v1486_v1 = vmul.f32 0.01, %v1470_v57 }
 0x26d   : > { %v1485_v62 = vmul.f32 0.01, %v1469_v60  ;;  %v3889_v63 = vpop.f32.mrb[10].mxu1  ;;  %3913 = vmatprep.mubr.msk.f32.mxu0 %vm1516_vm3, %v1499_v59 }
 0x26e   : > { %v1472_v2 = vadd.f32 %v3889_v63, %v4667_v61  ;;  %v1441_v3 = vpop.f32.mrb[11].mxu1  ;;  %v1502_v11 = vmax.f32 %v1470_v57, %v1486_v1 }
 0x26f   : > { %v1501_v4 = vmax.f32 %v1469_v60, %v1485_v62  ;;  %v1471_v5 = vadd.f32 %v4667_v61, %v1441_v3 }
 0x270   : > { %3914 = vmatmul.mubr.msk.f32.gmra.mrb[30].mxu0 %vm1516_vm3, %v1500_v0  ;;  %v1488_v12 = vmul.f32 0.01, %v1472_v2 }
 0x271   : > { %v1487_v8 = vmul.f32 0.01, %v1471_v5  ;;  %3916 = vmatprep.mubr.msk.f32.mxu0 %vm1516_vm3, %v1501_v4 }
 0x272   : > { %v1504_v16 = vmax.f32 %v1472_v2, %v1488_v12 }
 0x273   : > { %v1503_v13 = vmax.f32 %v1471_v5, %v1487_v8 }
 0x274   : > { %3917 = vmatmul.mubr.msk.f32.gmra.mrb[32].mxu0 %vm1516_vm3, %v1502_v11 }
 0x275   : > { %3919 = vmatprep.mubr.msk.f32.mxu0 %vm1516_vm3, %v1503_v13 }
 0x278   : > { %3920 = vmatmul.mubr.msk.f32.gmra.mrb[34].mxu0 %vm1516_vm3, %v1504_v16 }
 0x32f   : > { %v3900_v61 = vpop.f32.mrb[20].mxu0 }
 0x330   : > { %v1637_v18 = vadd.f32 %v3900_v61, %v4704_v17  ;;  %v1631_v21 = vpop.f32.mrb[21].mxu0 }
 0x331   : > { %v1632_v22 = vadd.f32 %v4704_v17, %v1631_v21 }
 0x332   : > { %v1711_v23 = vmul.f32 0.01, %v1637_v18 }
 0x333   : > { %v1710_v24 = vmul.f32 0.01, %v1632_v22  ;;  %v3903_v25 = vpop.f32.mrb[22].mxu0 }
 0x334   : > { %v1647_v26 = vadd.f32 %v3903_v25, %v4704_v17  ;;  %v1641_v27 = vpop.f32.mrb[23].mxu0  ;;  %v1727_v30 = vmax.f32 %v1637_v18, %v1711_v23 }
 0x335   : > { %v1726_v28 = vmax.f32 %v1632_v22, %v1710_v24  ;;  %v1642_v29 = vadd.f32 %v4704_v17, %v1641_v27 }
 0x336   : > { %v1713_v31 = vmul.f32 0.01, %v1647_v26 }
 0x337   : > { %v1712_v32 = vmul.f32 0.01, %v1642_v29  ;;  %v3906_v33 = vpop.f32.mrb[24].mxu0  ;;  %3930 = vmatprep.mubr.msk.f32.mxu1 %vm1516_vm3, %v1726_v28 }
 0x338   : > { %v1657_v34 = vadd.f32 %v3906_v33, %v4704_v17  ;;  %v1651_v35 = vpop.f32.mrb[25].mxu0  ;;  %3931 = vmatmul.mubr.msk.f32.vlgmr.msra.gmra.mrb[16].mxu1 %vm1516_vm3, %v1727_v30  ;;  %v1729_v38 = vmax.f32 %v1647_v26, %v1713_v31 }
 0x339   : > { %v1728_v36 = vmax.f32 %v1642_v29, %v1712_v32  ;;  %v1652_v37 = vadd.f32 %v4704_v17, %v1651_v35  ;;  %v4741_v29 = vld [vmem:[%s5278_s10] ss:$0 sm:$0xff] }
 0x33a   : > { %v1715_v39 = vmul.f32 0.01, %v1657_v34 }
 0x33b   : > { %v1714_v40 = vmul.f32 0.01, %v1652_v37  ;;  %v3909_v41 = vpop.f32.mrb[26].mxu0  ;;  %3933 = vmatprep.mubr.msk.f32.mxu1 %vm1516_vm3, %v1728_v36 }
 0x33c   : > { %v1667_v42 = vadd.f32 %v3909_v41, %v4704_v17  ;;  %v1661_v43 = vpop.f32.mrb[27].mxu0  ;;  %3934 = vmatmul.mubr.msk.f32.gmra.mrb[18].mxu1 %vm1516_vm3, %v1729_v38  ;;  %v1731_v47 = vmax.f32 %v1657_v34, %v1715_v39 }
 0x33d   : > { %v1730_v45 = vmax.f32 %v1652_v37, %v1714_v40  ;;  %v1662_v46 = vadd.f32 %v4704_v17, %v1661_v43 }
 0x33e   : > { %v1717_v48 = vmul.f32 0.01, %v1667_v42 }
 0x33f   : > { %v1716_v49 = vmul.f32 0.01, %v1662_v46  ;;  %v3912_v50 = vpop.f32.mrb[28].mxu0  ;;  %3936 = vmatprep.mubr.msk.f32.mxu1 %vm1516_vm3, %v1730_v45 }
 0x340   : > { %v1677_v51 = vadd.f32 %v3912_v50, %v4704_v17  ;;  %v1671_v52 = vpop.f32.mrb[29].mxu0  ;;  %3937 = vmatmul.mubr.msk.f32.gmra.mrb[20].mxu1 %vm1516_vm3, %v1731_v47  ;;  %v1733_v55 = vmax.f32 %v1667_v42, %v1717_v48 }
 0x341   : > { %v1732_v53 = vmax.f32 %v1662_v46, %v1716_v49  ;;  %v1672_v54 = vadd.f32 %v4704_v17, %v1671_v52 }
 0x342   : > { %v1719_v56 = vmul.f32 0.01, %v1677_v51 }
 0x343   : > { %v1718_v57 = vmul.f32 0.01, %v1672_v54  ;;  %v3915_v58 = vpop.f32.mrb[30].mxu0  ;;  %3939 = vmatprep.mubr.msk.f32.mxu1 %vm1516_vm3, %v1732_v53 }
 0x344   : > { %v1687_v59 = vadd.f32 %v3915_v58, %v4704_v17  ;;  %v1681_v60 = vpop.f32.mrb[31].mxu0  ;;  %3940 = vmatmul.mubr.msk.f32.gmra.mrb[22].mxu1 %vm1516_vm3, %v1733_v55  ;;  %v1735_v0 = vmax.f32 %v1677_v51, %v1719_v56 }
 0x345   : > { %v1734_v62 = vmax.f32 %v1672_v54, %v1718_v57  ;;  %v1682_v63 = vadd.f32 %v4704_v17, %v1681_v60 }
 0x346   : > { %v1721_v1 = vmul.f32 0.01, %v1687_v59 }
 0x347   : > { %v1720_v2 = vmul.f32 0.01, %v1682_v63  ;;  %v3918_v3 = vpop.f32.mrb[32].mxu0  ;;  %3942 = vmatprep.mubr.msk.f32.mxu1 %vm1516_vm3, %v1734_v62 }
 0x348   : > { %v1697_v4 = vadd.f32 %v3918_v3, %v4704_v17  ;;  %v1691_v5 = vpop.f32.mrb[33].mxu0  ;;  %3943 = vmatmul.mubr.msk.f32.gmra.mrb[24].mxu1 %vm1516_vm3, %v1735_v0  ;;  %v1737_v12 = vmax.f32 %v1687_v59, %v1721_v1 }
 0x349   : > { %v1736_v8 = vmax.f32 %v1682_v63, %v1720_v2  ;;  %v1692_v11 = vadd.f32 %v4704_v17, %v1691_v5 }
 0x34a   : > { %v1723_v13 = vmul.f32 0.01, %v1697_v4 }
 0x34b   : > { %v1722_v16 = vmul.f32 0.01, %v1692_v11  ;;  %v3921_v61 = vpop.f32.mrb[34].mxu0  ;;  %3945 = vmatprep.mubr.msk.f32.mxu1 %vm1516_vm3, %v1736_v8 }
 0x34c   : > { %v1707_v18 = vadd.f32 %v3921_v61, %v4704_v17  ;;  %v1701_v21 = vpop.f32.mrb[35].mxu0  ;;  %3946 = vmatmul.mubr.msk.f32.gmra.mrb[26].mxu1 %vm1516_vm3, %v1737_v12  ;;  %v1739_v24 = vmax.f32 %v1697_v4, %v1723_v13 }
 0x34d   : > { %v1738_v22 = vmax.f32 %v1692_v11, %v1722_v16  ;;  %v1702_v23 = vadd.f32 %v4704_v17, %v1701_v21 }
 0x34e   : > { %v1725_v25 = vmul.f32 0.01, %v1707_v18 }
 0x34f   : > { %v1724_v26 = vmul.f32 0.01, %v1702_v23  ;;  %3948 = vmatprep.mubr.msk.f32.mxu1 %vm1516_vm3, %v1738_v22 }
 0x350   : > { %3949 = vmatmul.mubr.msk.f32.gmra.mrb[28].mxu1 %vm1516_vm3, %v1739_v24  ;;  %v1741_v28 = vmax.f32 %v1707_v18, %v1725_v25 }
 0x351   : > { %v1740_v27 = vmax.f32 %v1702_v23, %v1724_v26 }
 0x353   : > { %3951 = vmatprep.mubr.msk.f32.mxu1 %vm1516_vm3, %v1740_v27 }
 0x354   : > { %3952 = vmatmul.mubr.msk.f32.gmra.mrb[30].mxu1 %vm1516_vm3, %v1741_v28 }
 0x40b   : > { %v3932_v30 = vpop.f32.mrb[16].mxu1 }
 0x40c   : > { %v1873_v17 = vadd.f32 %v3932_v30, %v4741_v29  ;;  %v1867_v31 = vpop.f32.mrb[17].mxu1 }
 0x40d   : > { %v1868_v32 = vadd.f32 %v4741_v29, %v1867_v31 }
 0x40e   : > { %v1947_v33 = vmul.f32 0.01, %v1873_v17 }
 0x40f   : > { %v1946_v34 = vmul.f32 0.01, %v1868_v32  ;;  %v3935_v35 = vpop.f32.mrb[18].mxu1 }
 0x410   : > { %v1883_v36 = vadd.f32 %v3935_v35, %v4741_v29  ;;  %v1877_v37 = vpop.f32.mrb[19].mxu1  ;;  %v4746_v38 = vmax.f32 %v1873_v17, %v1947_v33 }
 0x411   : > { %v1878_v39 = vadd.f32 %v4741_v29, %v1877_v37  ;;  %v4749_v40 = vmax.f32 %v1868_v32, %v1946_v34 }
 0x412   : > { %v1949_v41 = vmul.f32 0.01, %v1883_v36  ;;  %v1982_v42 = vsel %vm1978_vm6, %v4746_v38, 0.0 }
 0x413   : > { %v1948_v43 = vmul.f32 0.01, %v1878_v39  ;;  %1983 = vadd.xlane.f32.xlu1 %v1982_v42  ;;  %v3938_v45 = vpop.f32.mrb[20].mxu1  ;;  %v1979_v46 = vsel %vm1978_vm6, %v4749_v40, 0.0 }
 0x414   : > { %v1893_v47 = vadd.f32 %v3938_v45, %v4741_v29  ;;  %1980 = vadd.xlane.f32.xlu0 %v1979_v46  ;;  %v1887_v48 = vpop.f32.mrb[21].mxu1  ;;  %v4756_v49 = vmax.f32 %v1883_v36, %v1949_v41 }
 0x415   : > { %v1888_v50 = vadd.f32 %v4741_v29, %v1887_v48  ;;  %v4761_v52 = vmax.f32 %v1878_v39, %v1948_v43 }
 0x416   : > { %v1988_v51 = vsel %vm1978_vm6, %v4756_v49, 0.0  ;;  %v1951_v53 = vmul.f32 0.01, %v1893_v47 }
 0x417   : > { %v1950_v54 = vmul.f32 0.01, %v1888_v50  ;;  %v3941_v55 = vpop.f32.mrb[22].mxu1  ;;  %v1985_v60 = vsel %vm1978_vm6, %v4761_v52, 0.0 }
 0x418   : > { %v1903_v56 = vadd.f32 %v3941_v55, %v4741_v29  ;;  %1989 = vadd.xlane.f32.xlu0 %v1988_v51  ;;  %v1897_v57 = vpop.f32.mrb[23].mxu1  ;;  %v4771_v2 = vmax.f32 %v1893_v47, %v1951_v53 }
 0x419   : > { %v1898_v58 = vadd.f32 %v4741_v29, %v1897_v57  ;;  %v4765_v59 = vmax.f32 %v1888_v50, %v1950_v54 }
 0x41a   : > { %v1953_v62 = vmul.f32 0.01, %v1903_v56  ;;  %v1994_v61 = vsel %vm1978_vm6, %v4771_v2, 0.0 }
 0x41b   : > { %v1952_v63 = vmul.f32 0.01, %v1898_v58  ;;  %v3944_v0 = vpop.f32.mrb[24].mxu1  ;;  %v1991_v1 = vsel %vm1978_vm6, %v4765_v59, 0.0 }
 0x41c   : > { %v1913_v3 = vadd.f32 %v3944_v0, %v4741_v29  ;;  %v1907_v4 = vpop.f32.mrb[25].mxu1  ;;  %1992 = vadd.xlane.f32.xlu1 %v1991_v1  ;;  %1986 = vadd.xlane.f32.xlu0 %v1985_v60  ;;  %v4781_v18 = vmax.f32 %v1903_v56, %v1953_v62 }
 0x41d   : > { %v1908_v5 = vadd.f32 %v4741_v29, %v1907_v4  ;;  %v4775_v8 = vmax.f32 %v1898_v58, %v1952_v63 }
 0x41e   : > { %v1955_v11 = vmul.f32 0.01, %v1913_v3  ;;  %v2000_v17 = vsel %vm1978_vm6, %v4781_v18, 0.0 }
 0x41f   : > { %v1954_v12 = vmul.f32 0.01, %v1908_v5  ;;  %v3947_v13 = vpop.f32.mrb[26].mxu1  ;;  %v1997_v16 = vsel %vm1978_vm6, %v4775_v8, 0.0 }
 0x420   : > { %v1923_v21 = vadd.f32 %v3947_v13, %v4741_v29  ;;  %v1917_v22 = vpop.f32.mrb[27].mxu1  ;;  %1998 = vadd.xlane.f32.xlu1 %v1997_v16  ;;  %1995 = vadd.xlane.f32.xlu0 %v1994_v61  ;;  %v4787_v26 = vmax.f32 %v1913_v3, %v1955_v11 }
 0x421   : > { %v1918_v23 = vadd.f32 %v4741_v29, %v1917_v22  ;;  %v4785_v24 = vmax.f32 %v1908_v5, %v1954_v12 }
 0x422   : > { %v1957_v25 = vmul.f32 0.01, %v1923_v21  ;;  %v2006_v35 = vsel %vm1978_vm6, %v4787_v26, 0.0 }
 0x423   : > { %v1956_v27 = vmul.f32 0.01, %v1918_v23  ;;  %v3950_v28 = vpop.f32.mrb[28].mxu1  ;;  %v2003_v30 = vsel %vm1978_vm6, %v4785_v24, 0.0 }
 0x424   : > { %v1933_v31 = vadd.f32 %v3950_v28, %v4741_v29  ;;  %v1927_v32 = vpop.f32.mrb[29].mxu1  ;;  %2004 = vadd.xlane.f32.xlu1 %v2003_v30  ;;  %2001 = vadd.xlane.f32.xlu0 %v2000_v17  ;;  %v4799_v36 = vmax.f32 %v1923_v21, %v1957_v25 }
 0x425   : > { %v1928_v33 = vadd.f32 %v4741_v29, %v1927_v32  ;;  %v4795_v34 = vmax.f32 %v1918_v23, %v1956_v27 }
 0x426   : > { %v1959_v37 = vmul.f32 0.01, %v1933_v31  ;;  %v2012_v48 = vsel %vm1978_vm6, %v4799_v36, 0.0 }
 0x427   : > { %v1958_v39 = vmul.f32 0.01, %v1928_v33  ;;  %v3953_v41 = vpop.f32.mrb[30].mxu1  ;;  %v2009_v42 = vsel %vm1978_vm6, %v4795_v34, 0.0 }
 0x428   : > { %v1943_v43 = vadd.f32 %v3953_v41, %v4741_v29  ;;  %v1937_v45 = vpop.f32.mrb[31].mxu1  ;;  %2010 = vadd.xlane.f32.xlu1 %v2009_v42  ;;  %2007 = vadd.xlane.f32.xlu0 %v2006_v35  ;;  %v4811_v54 = vmax.f32 %v1933_v31, %v1959_v37 }
 0x429   : > { %v1938_v46 = vadd.f32 %v4741_v29, %v1937_v45  ;;  %v4805_v47 = vmax.f32 %v1928_v33, %v1958_v39 }
 0x42a   : > { %v1961_v50 = vmul.f32 0.01, %v1943_v43  ;;  %v2018_v29 = vsel %vm1978_vm6, %v4811_v54, 0.0 }
 0x42b   : > { %v1960_v51 = vmul.f32 0.01, %v1938_v46  ;;  %v2015_v53 = vsel %vm1978_vm6, %v4805_v47, 0.0 }
 0x42c   : > { %2016 = vadd.xlane.f32.xlu1 %v2015_v53  ;;  %2013 = vadd.xlane.f32.xlu0 %v2012_v48  ;;  %v4819_v57 = vmax.f32 %v1943_v43, %v1961_v50 }
 0x42d   : > { %v4813_v55 = vmax.f32 %v1938_v46, %v1960_v51 }
 0x42e   : > { %v2024_v58 = vsel %vm1978_vm6, %v4819_v57, 0.0 }
 0x42f   : > { %v2021_v56 = vsel %vm1978_vm6, %v4813_v55, 0.0 }
 0x430   : > { %2022 = vadd.xlane.f32.xlu1 %v2021_v56  ;;  %2019 = vadd.xlane.f32.xlu0 %v2018_v29 }
 0x434   : > { %2025 = vadd.xlane.f32.xlu0 %v2024_v58 }
 0x4a0   : > { %v1984_v60 = vpop.xlane.xlu1 %1983 }
 0x4a1   : > { %v2029_v62 = vmul.f32 0.0625, %v1984_v60  ;;  %v1981_v63 = vpop.xlane.xlu0 %1980 }
 0x4a2   : > { %v2028_v0 = vmul.f32 0.0625, %v1981_v63 }
 0x4a3   : > { %v4824_v1 = vsub.f32 %v4746_v38, %v2029_v62 }
 0x4a4   : > { %v4827_v3 = vsub.f32 %v4749_v40, %v2028_v0 }
 0x4a5   : > { %v1990_v4 = vpop.xlane.xlu0 %1989  ;;  %v2061_v5 = vmul.f32 %v4824_v1, %v4824_v1 }
 0x4a6   : > { %v2031_v11 = vmul.f32 0.0625, %v1990_v4  ;;  %v2060_v12 = vmul.f32 %v4827_v3, %v4827_v3 }
 0x4a7   : > { %v2079_v13 = vsel %vm1978_vm6, %v2061_v5, 0.0 }
 0x4a8   : > { %v4835_v16 = vsub.f32 %v4756_v49, %v2031_v11  ;;  %2080 = vadd.xlane.f32.xlu0 %v2079_v13  ;;  %v2076_v38 = vsel %vm1978_vm6, %v2060_v12, 0.0 }
 0x4a9   : > { %2077 = vadd.xlane.f32.xlu1 %v2076_v38  ;;  %v1993_v61 = vpop.xlane.xlu1 %1992  ;;  %v1987_v40 = vpop.xlane.xlu0 %1986 }
 0x4aa   : > { %v2032_v21 = vmul.f32 0.0625, %v1993_v61  ;;  %v2030_v22 = vmul.f32 0.0625, %v1987_v40  ;;  %v2063_v23 = vmul.f32 %v4835_v16, %v4835_v16 }
 0x4ac   : > { %v4841_v25 = vsub.f32 %v4765_v59, %v2032_v21  ;;  %v4844_v27 = vsub.f32 %v4761_v52, %v2030_v22  ;;  %v2085_v49 = vsel %vm1978_vm6, %v2063_v23, 0.0 }
 0x4ad   : > { %v1999_v28 = vpop.xlane.xlu1 %1998  ;;  %2086 = vadd.xlane.f32.xlu0 %v2085_v49  ;;  %v1996_v30 = vpop.xlane.xlu0 %1995 }
 0x4ae   : > { %v2034_v17 = vmul.f32 0.0625, %v1999_v28  ;;  %v2033_v31 = vmul.f32 0.0625, %v1996_v30  ;;  %v2062_v32 = vmul.f32 %v4844_v27, %v4844_v27  ;;  %v2064_v52 = vmul.f32 %v4841_v25, %v4841_v25 }
 0x4b0   : > { %v4850_v33 = vsub.f32 %v4775_v8, %v2034_v17  ;;  %v4853_v35 = vsub.f32 %v4771_v2, %v2033_v31  ;;  %v2082_v59 = vsel %vm1978_vm6, %v2062_v32, 0.0  ;;  %v2088_v46 = vsel %vm1978_vm6, %v2064_v52, 0.0 }
 0x4b1   : > { %v2005_v37 = vpop.xlane.xlu1 %2004  ;;  %2083 = vadd.xlane.f32.xlu1 %v2082_v59  ;;  %v2002_v39 = vpop.xlane.xlu0 %2001 }
 0x4b2   : > { %v2036_v41 = vmul.f32 0.0625, %v2005_v37  ;;  %v2035_v42 = vmul.f32 0.0625, %v2002_v39  ;;  %v2065_v43 = vmul.f32 %v4853_v35, %v4853_v35  ;;  %v2066_v8 = vmul.f32 %v4850_v33, %v4850_v33 }
 0x4b4   : > { %v4863_v45 = vsub.f32 %v4785_v24, %v2036_v41  ;;  %v4866_v2 = vsub.f32 %v4781_v18, %v2035_v42  ;;  %v2091_v48 = vsel %vm1978_vm6, %v2065_v43, 0.0  ;;  %v2094_v58 = vsel %vm1978_vm6, %v2066_v8, 0.0  ;;  %v4925_v43 = vld [vmem:[%s700_s1] ss:$0 sm:$0xff] }
 0x4b5   : > { %v2011_v50 = vpop.xlane.xlu1 %2010  ;;  %2089 = vadd.xlane.f32.xlu1 %v2088_v46  ;;  %2092 = vadd.xlane.f32.xlu0 %v2091_v48  ;;  %v2008_v51 = vpop.xlane.xlu0 %2007  ;;  %v2236_v42 = vshrl.u32 %v753_v44, 7  ;;  %v4332_v46 = vmov 1.0  }
 0x4b6   : > { %v2038_v53 = vmul.f32 0.0625, %v2011_v50  ;;  %v2037_v56 = vmul.f32 0.0625, %v2008_v51  ;;  %v2067_v29 = vmul.f32 %v4866_v2, %v4866_v2  ;;  %v2068_v62 = vmul.f32 %v4863_v45, %v4863_v45 }
 0x4b7   : > { %v4927_v8 = vadd.s32 8, %v2236_v42  ;;  %vm2248_vm7 = vcmp.eq.s32.totalorder %v2236_v42, %v4925_v43  ;;  %v4938_v44 = vadd.s32 16, %v2236_v42  ;;  %v4940_v48 = vadd.s32 24, %v2236_v42 }
 0x4b8   : > { %v4874_v24 = vsub.f32 %v4795_v34, %v2038_v53  ;;  %v4877_v18 = vsub.f32 %v4787_v26, %v2037_v56  ;;  %v2097_v60 = vsel %vm1978_vm6, %v2067_v29, 0.0  ;;  %v2100_v13 = vsel %vm1978_vm6, %v2068_v62, 0.0  ;;  %3986 = vmatprep.mubr.msk.f32.mxu0 %vm2248_vm7, %v4332_v46  ;;  %4030 = vmatprep.mubr.msk.f32.mxu1 %vm2248_vm7, %v4332_v46 }
 0x4b9   : > { %v2017_v63 = vpop.xlane.xlu1 %2016  ;;  %2095 = vadd.xlane.f32.xlu1 %v2094_v58  ;;  %2098 = vadd.xlane.f32.xlu0 %v2097_v60  ;;  %v2014_v0 = vpop.xlane.xlu0 %2013  ;;  %vm2249_vm8 = vcmp.eq.s32.totalorder %v4927_v8, %v4925_v43  ;;  %vm2250_vm9 = vcmp.eq.s32.totalorder %v4938_v44, %v4925_v43  ;;  %vm2251_vm10 = vcmp.eq.s32.totalorder %v4940_v48, %v4925_v43  ;;  %v4954_v50 = vadd.s32 32, %v2236_v42  ;;  %v2401_v8 = vld [vmem:[#allocation3] sm:$0xff] }
 0x4ba   : > { %v2040_v4 = vmul.f32 0.0625, %v2017_v63  ;;  %v2039_v5 = vmul.f32 0.0625, %v2014_v0  ;;  %v2069_v11 = vmul.f32 %v4877_v18, %v4877_v18  ;;  %v2070_v34 = vmul.f32 %v4874_v24, %v4874_v24 }
 0x4bb   : > { %v4956_v51 = vadd.s32 40, %v2236_v42  ;;  %vm2252_vm11 = vcmp.eq.s32.totalorder %v4954_v50, %v4925_v43  ;;  %v4970_v53 = vadd.s32 48, %v2236_v42  ;;  %v4972_v56 = vadd.s32 56, %v2236_v42 }
 0x4bc   : > { %v4887_v26 = vsub.f32 %v4805_v47, %v2040_v4  ;;  %v4890_v12 = vsub.f32 %v4799_v36, %v2039_v5  ;;  %v2103_v38 = vsel %vm1978_vm6, %v2069_v11, 0.0  ;;  %v2106_v49 = vsel %vm1978_vm6, %v2070_v34, 0.0 }
 0x4bd   : > { %v2023_v61 = vpop.xlane.xlu1 %2022  ;;  %2101 = vadd.xlane.f32.xlu1 %v2100_v13  ;;  %2104 = vadd.xlane.f32.xlu0 %v2103_v38  ;;  %v2020_v40 = vpop.xlane.xlu0 %2019  ;;  %vm2253_vm12 = vcmp.eq.s32.totalorder %v4956_v51, %v4925_v43  ;;  %vm2254_vm13 = vcmp.eq.s32.totalorder %v4970_v53, %v4925_v43  ;;  %vm2255_vm14 = vcmp.eq.s32.totalorder %v4972_v56, %v4925_v43  ;;  %v2403_v53 = vld [vmem:[#allocation3 + $0x10] sm:$0xff]  ;;  %v2405_v56 = vld [vmem:[#allocation3 + $0x20] sm:$0xff] }
 0x4be   : > { %v2042_v21 = vmul.f32 0.0625, %v2023_v61  ;;  %v2041_v22 = vmul.f32 0.0625, %v2020_v40  ;;  %v2071_v23 = vmul.f32 %v4890_v12, %v4890_v12  ;;  %v2072_v30 = vmul.f32 %v4887_v26, %v4887_v26 }
 0x4c0   : > { %v4898_v47 = vsub.f32 %v4813_v55, %v2042_v21  ;;  %v4901_v36 = vsub.f32 %v4811_v54, %v2041_v22  ;;  %v2109_v28 = vsel %vm1978_vm6, %v2071_v23, 0.0  ;;  %v2112_v55 = vsel %vm1978_vm6, %v2072_v30, 0.0 }
 0x4c1   : > { %2107 = vadd.xlane.f32.xlu1 %v2106_v49  ;;  %2110 = vadd.xlane.f32.xlu0 %v2109_v28  ;;  %v2026_v17 = vpop.xlane.xlu0 %2025  ;;  %v4989_v49 = vld [vmem:[%s5279_s11] ss:$0 sm:$0xff] }
 0x4c2   : > { %v2043_v31 = vmul.f32 0.0625, %v2026_v17  ;;  %v2073_v32 = vmul.f32 %v4901_v36, %v4901_v36  ;;  %v2074_v52 = vmul.f32 %v4898_v47, %v4898_v47 }
 0x4c4   : > { %v4909_v59 = vsub.f32 %v4819_v57, %v2043_v31  ;;  %v2115_v54 = vsel %vm1978_vm6, %v2073_v32, 0.0  ;;  %v2118_v39 = vsel %vm1978_vm6, %v2074_v52, 0.0  ;;  %v4331_v57 = vmov 1.0|1.0   ;;  %v4996_v52 = vld [vmem:[%s5280_s12] ss:$0 sm:$0xff] }
 0x4c5   : > { %2113 = vadd.xlane.f32.xlu1 %v2112_v55  ;;  %2116 = vadd.xlane.f32.xlu0 %v2115_v54 }
 0x4c6   : > { %v2075_v37 = vmul.f32 %v4909_v59, %v4909_v59  ;;  %4176 = vmatprep.subr.bf16.mxu1 %v4331_v57 }
 0x4c7   : > { %4177 = vmatpush3.bf16.msra.mxu1 %v4331_v57 }
 0x4c8   : > { %v2121_v41 = vsel %vm1978_vm6, %v2075_v37, 0.0  ;;  %4178 = vmatprep.subr.bf16.mxu1 %v4331_v57 }
 0x4c9   : > { %2119 = vadd.xlane.f32.xlu1 %v2118_v39  ;;  %2122 = vadd.xlane.f32.xlu0 %v2121_v41 }
 0x4cb   : > { %4179 = vmatpush3.bf16.msra.mxu1 %v4331_v57 }
 0x4cc   : > { %4180 = vmatprep.subr.bf16.mxu1 %v4331_v57 }
 0x4cf   : > { %4181 = vmatpush3.bf16.msra.mxu1 %v4331_v57 }
 0x4d0   : > { %4182 = vmatprep.subr.bf16.mxu1 %v4331_v57 }
 0x4d3   : > { %4183 = vmatpush3.bf16.msra.mxu1 %v4331_v57 }
 0x4d4   : > { %4184 = vmatprep.subr.bf16.mxu1 %v4331_v57 }
 0x4d7   : > { %4185 = vmatpush3.bf16.msra.mxu1 %v4331_v57 }
 0x4d8   : > { %4186 = vmatprep.subr.bf16.mxu1 %v4331_v57 }
 0x4db   : > { %4187 = vmatpush3.bf16.msra.mxu1 %v4331_v57 }
 0x4dc   : > { %4188 = vmatprep.subr.bf16.mxu1 %v4331_v57 }
 0x4df   : > { %4189 = vmatpush3.bf16.msra.mxu1 %v4331_v57 }
 0x4e0   : > { %4190 = vmatprep.subr.bf16.mxu1 %v4331_v57 }
 0x4e3   : > { %4191 = vmatpush3.bf16.msra.mxu1 %v4331_v57 }
 0x4e6   : > { %4031 = vmatmul.mubr.msk.f32.vlgmr.msra.gmra.mrb[32].mxu1 %vm2249_vm8, %v4332_v46 }
 0x4e7   : > { %4033 = vmatprep.mubr.msk.f32.mxu1 %vm2250_vm9, %v4332_v46 }
 0x4ea   : > { %4034 = vmatmul.mubr.msk.f32.gmra.mrb[34].mxu1 %vm2251_vm10, %v4332_v46 }
 0x4eb   : > { %4036 = vmatprep.mubr.msk.f32.mxu1 %vm2252_vm11, %v4332_v46 }
 0x4ee   : > { %4037 = vmatmul.mubr.msk.f32.gmra.mrb[36].mxu1 %vm2253_vm12, %v4332_v46 }
 0x4ef   : > { %4039 = vmatprep.mubr.msk.f32.mxu1 %vm2254_vm13, %v4332_v46 }
 0x4f2   : > { %4040 = vmatmul.mubr.msk.f32.gmra.mrb[38].mxu1 %vm2255_vm14, %v4332_v46 }
 0x535   : > { %v2081_v29 = vpop.xlane.xlu0 %2080 }
 0x536   : > { %v2125_v58 = vmul.f32 0.0625, %v2081_v29  ;;  %v2078_v60 = vpop.xlane.xlu1 %2077 }
 0x537   : > { %v2124_v62 = vmul.f32 0.0625, %v2078_v60 }
 0x538   : > { %v2141_v63 = vadd.f32 1e-05, %v2125_v58 }
 0x539   : > { %v2140_v0 = vadd.f32 1e-05, %v2124_v62 }
 0x53a   : > { %4254 = vrsqrt.f32 %v2141_v63  ;;  %v2087_v4 = vpop.xlane.xlu0 %2086 }
 0x53b   : > { %4256 = vrsqrt.f32 %v2140_v0  ;;  %v2127_v5 = vmul.f32 0.0625, %v2087_v4 }
 0x53d   : > { %v2143_v11 = vadd.f32 1e-05, %v2127_v5 }
 0x53e   : > { %v2084_v34 = vpop.xlane.xlu1 %2083 }
 0x53f   : > { %4258 = vrsqrt.f32 %v2143_v11  ;;  %v2126_v13 = vmul.f32 0.0625, %v2084_v34 }
 0x541   : > { %v2142_v38 = vadd.f32 1e-05, %v2126_v13 }
 0x542   : > { %v2090_v61 = vpop.xlane.xlu1 %2089  ;;  %v2093_v40 = vpop.xlane.xlu0 %2092 }
 0x543   : > { %4260 = vrsqrt.f32 %v2142_v38  ;;  %v2128_v21 = vmul.f32 0.0625, %v2090_v61  ;;  %v2129_v22 = vmul.f32 0.0625, %v2093_v40 }
 0x544   : > { %v4255_v23 = vpop.eup %4254 }
 0x545   : > { %v4257_v28 = vpop.eup %4256  ;;  %v2144_v30 = vadd.f32 1e-05, %v2128_v21  ;;  %v2145_v17 = vadd.f32 1e-05, %v2129_v22  ;;  %v2173_v31 = vmul.f32 %v4255_v23, %v4824_v1 }
 0x546   : > { %v2096_v32 = vpop.xlane.xlu1 %2095  ;;  %v2099_v55 = vpop.xlane.xlu0 %2098  ;;  %v2172_v54 = vmul.f32 %v4257_v28, %v4827_v3 }
 0x547   : > { %4262 = vrsqrt.f32 %v2144_v30  ;;  %v2130_v37 = vmul.f32 0.0625, %v2096_v32  ;;  %v2131_v39 = vmul.f32 0.0625, %v2099_v55  ;;  %v2196_v41 = vmul.f32 %v4989_v49, %v2173_v31 }
 0x548   : > { %4264 = vrsqrt.f32 %v2145_v17  ;;  %v2195_v57 = vmul.f32 %v4989_v49, %v2172_v54 }
 0x549   : > { %v4259_v42 = vpop.eup %4258  ;;  %v2146_v29 = vadd.f32 1e-05, %v2130_v37  ;;  %v2147_v1 = vadd.f32 1e-05, %v2131_v39  ;;  %v2219_v58 = vadd.f32 %v4996_v52, %v2196_v41 }
 0x54a   : > { %v2102_v60 = vpop.xlane.xlu1 %2101  ;;  %v2105_v3 = vpop.xlane.xlu0 %2104  ;;  %v2218_v62 = vadd.f32 %v4996_v52, %v2195_v57  ;;  %v2175_v63 = vmul.f32 %v4259_v42, %v4835_v16 }
 0x54b   : > { %4266 = vrsqrt.f32 %v2146_v29  ;;  %v2132_v0 = vmul.f32 0.0625, %v2102_v60  ;;  %v2133_v4 = vmul.f32 0.0625, %v2105_v3 }
 0x54c   : > { %4268 = vrsqrt.f32 %v2147_v1  ;;  %v4144_v5 = vpack.c.bf16 %v2219_v58, %v2218_v62  ;;  %v2198_v21 = vmul.f32 %v4989_v49, %v2175_v63 }
 0x54d   : > { %v4261_v11 = vpop.eup %4260  ;;  %v2148_v34 = vadd.f32 1e-05, %v2132_v0  ;;  %v2149_v13 = vadd.f32 1e-05, %v2133_v4 }
 0x54e   : > { %v2108_v38 = vpop.xlane.xlu1 %2107  ;;  %4145 = vmatprep.subr.bf16.mxu0 %v4144_v5  ;;  %v2111_v61 = vpop.xlane.xlu0 %2110  ;;  %v2174_v40 = vmul.f32 %v4261_v11, %v4844_v27  ;;  %v2221_v37 = vadd.f32 %v4996_v52, %v2198_v21 }
 0x54f   : > { %4270 = vrsqrt.f32 %v2148_v34  ;;  %v2134_v22 = vmul.f32 0.0625, %v2108_v38  ;;  %v2135_v23 = vmul.f32 0.0625, %v2111_v61  ;;  %4147 = vmatpush3.bf16.msra.mxu0 %v4144_v5 }
 0x550   : > { %4272 = vrsqrt.f32 %v2149_v13  ;;  %v2197_v16 = vmul.f32 %v4989_v49, %v2174_v40 }
 0x551   : > { %v4263_v28 = vpop.eup %4262  ;;  %v2150_v30 = vadd.f32 1e-05, %v2134_v22  ;;  %v2151_v17 = vadd.f32 1e-05, %v2135_v23 }
 0x552   : > { %v4265_v31 = vpop.eup %4264  ;;  %v2114_v32 = vpop.xlane.xlu1 %2113  ;;  %v2220_v54 = vadd.f32 %v4996_v52, %v2197_v16  ;;  %v2176_v27 = vmul.f32 %v4263_v28, %v4841_v25 }
 0x553   : > { %v2117_v55 = vpop.xlane.xlu0 %2116  ;;  %4274 = vrsqrt.f32 %v2150_v30  ;;  %v2136_v39 = vmul.f32 0.0625, %v2114_v32  ;;  %v2177_v57 = vmul.f32 %v4265_v31, %v4853_v35 }
 0x554   : > { %v2137_v41 = vmul.f32 0.0625, %v2117_v55  ;;  %4276 = vrsqrt.f32 %v2151_v17  ;;  %v4148_v42 = vpack.c.bf16 %v2221_v37, %v2220_v54  ;;  %v2199_v29 = vmul.f32 %v4989_v49, %v2176_v27 }
 0x555   : > { %v4267_v1 = vpop.eup %4266  ;;  %v2152_v58 = vadd.f32 1e-05, %v2136_v39  ;;  %v2200_v3 = vmul.f32 %v4989_v49, %v2177_v57 }
 0x556   : > { %v2153_v60 = vadd.f32 1e-05, %v2137_v41  ;;  %v4269_v62 = vpop.eup %4268  ;;  %v2120_v63 = vpop.xlane.xlu1 %2119  ;;  %4149 = vmatprep.subr.bf16.mxu0 %v4148_v42  ;;  %v2222_v25 = vadd.f32 %v4996_v52, %v2199_v29  ;;  %v2178_v4 = vmul.f32 %v4267_v1, %v4850_v33 }
 0x557   : > { %v2123_v0 = vpop.xlane.xlu0 %2122  ;;  %4278 = vrsqrt.f32 %v2152_v58  ;;  %v2138_v5 = vmul.f32 0.0625, %v2120_v63  ;;  %4151 = vmatpush3.bf16.msra.mxu0 %v4148_v42  ;;  %v2223_v11 = vadd.f32 %v4996_v52, %v2200_v3  ;;  %v2179_v34 = vmul.f32 %v4269_v62, %v4866_v2 }
 0x558   : > { %v2139_v35 = vmul.f32 0.0625, %v2123_v0  ;;  %4280 = vrsqrt.f32 %v2153_v60  ;;  %v2201_v13 = vmul.f32 %v4989_v49, %v2178_v4 }
 0x559   : > { %v4271_v38 = vpop.eup %4270  ;;  %v2154_v61 = vadd.f32 1e-05, %v2138_v5  ;;  %v4152_v21 = vpack.c.bf16 %v2223_v11, %v2222_v25  ;;  %v2202_v23 = vmul.f32 %v4989_v49, %v2179_v34 }
 0x55a   : > { %v2155_v40 = vadd.f32 1e-05, %v2139_v35  ;;  %v4273_v22 = vpop.eup %4272  ;;  %v2224_v33 = vadd.f32 %v4996_v52, %v2201_v13  ;;  %v2180_v16 = vmul.f32 %v4271_v38, %v4863_v45 }
 0x55b   : > { %4282 = vrsqrt.f32 %v2154_v61  ;;  %4153 = vmatprep.subr.bf16.mxu0 %v4152_v21  ;;  %v2181_v28 = vmul.f32 %v4273_v22, %v4877_v18  ;;  %v2225_v2 = vadd.f32 %v4996_v52, %v2202_v23 }
 0x55c   : > { %4284 = vrsqrt.f32 %v2155_v40  ;;  %4155 = vmatpush3.bf16.msra.mxu0 %v4152_v21  ;;  %v2203_v30 = vmul.f32 %v4989_v49, %v2180_v16  ;;  %v2407_v16 = vld [vmem:[#allocation3 + $0x30] sm:$0xff] }
 0x55d   : > { %v4275_v17 = vpop.eup %4274  ;;  %v2204_v31 = vmul.f32 %v4989_v49, %v2181_v28  ;;  %v4156_v55 = vpack.c.bf16 %v2225_v2, %v2224_v33  ;;  %v2408_v33 = vld [vmem:[#allocation3 + $0x38] sm:$0xff] }
 0x55e   : > { %v4277_v32 = vpop.eup %4276  ;;  %v2226_v54 = vadd.f32 %v4996_v52, %v2203_v30  ;;  %v2182_v37 = vmul.f32 %v4275_v17, %v4874_v24  ;;  %v2273_v17 = vld [vmem:[#allocation2 + $0x8] sm:$0xff] }
 0x55f   : > { %v2227_v45 = vadd.f32 %v4996_v52, %v2204_v31  ;;  %v2183_v27 = vmul.f32 %v4277_v32, %v4890_v12  ;;  %4157 = vmatprep.subr.bf16.mxu0 %v4156_v55  ;;  %v2272_v31 = vld [vmem:[#allocation2] sm:$0xff] }
 0x560   : > { %v2205_v18 = vmul.f32 %v4989_v49, %v2182_v37  ;;  %4159 = vmatpush3.bf16.msra.mxu0 %v4156_v55 }
 0x561   : > { %v4279_v39 = vpop.eup %4278  ;;  %v4160_v41 = vpack.c.bf16 %v2227_v45, %v2226_v54  ;;  %v2206_v57 = vmul.f32 %v4989_v49, %v2183_v27  ;;  %v2275_v45 = vld [vmem:[#allocation2 + $0x18] sm:$0xff]  ;;  %v2274_v27 = vld [vmem:[#allocation2 + $0x10] sm:$0xff] }
 0x562   : > { %v4281_v42 = vpop.eup %4280  ;;  %v2228_v29 = vadd.f32 %v4996_v52, %v2205_v18  ;;  %v2184_v1 = vmul.f32 %v4279_v39, %v4887_v26 }
 0x563   : > { %4161 = vmatprep.subr.bf16.mxu0 %v4160_v41  ;;  %v2229_v24 = vadd.f32 %v4996_v52, %v2206_v57  ;;  %v2185_v58 = vmul.f32 %v4281_v42, %v4901_v36  ;;  %v2277_v42 = vld [vmem:[#allocation2 + $0x28] sm:$0xff] }
 0x564   : > { %v2207_v12 = vmul.f32 %v4989_v49, %v2184_v1  ;;  %4163 = vmatpush3.bf16.msra.mxu0 %v4160_v41 }
 0x565   : > { %v4283_v60 = vpop.eup %4282  ;;  %v4164_v3 = vpack.c.bf16 %v2229_v24, %v2228_v29  ;;  %v2208_v62 = vmul.f32 %v4989_v49, %v2185_v58  ;;  %v2276_v29 = vld [vmem:[#allocation2 + $0x20] sm:$0xff] }
 0x566   : > { %v4285_v63 = vpop.eup %4284  ;;  %v2230_v0 = vadd.f32 %v4996_v52, %v2207_v12  ;;  %v2186_v25 = vmul.f32 %v4283_v60, %v4898_v47  ;;  %v2279_v60 = vld [vmem:[#allocation2 + $0x38] sm:$0xff] }
 0x567   : > { %4165 = vmatprep.subr.bf16.mxu0 %v4164_v3  ;;  %v2231_v26 = vadd.f32 %v4996_v52, %v2208_v62  ;;  %v2187_v4 = vmul.f32 %v4285_v63, %v4909_v59  ;;  %v2402_v59 = vld [vmem:[#allocation3 + $0x8] sm:$0xff] }
 0x568   : > { %v2209_v5 = vmul.f32 %v4989_v49, %v2186_v25  ;;  %4167 = vmatpush3.bf16.msra.mxu0 %v4164_v3  ;;  %v2278_v3 = vld [vmem:[#allocation2 + $0x30] sm:$0xff] }
 0x569   : > { %v4168_v36 = vpack.c.bf16 %v2231_v26, %v2230_v0  ;;  %v2210_v35 = vmul.f32 %v4989_v49, %v2187_v4  ;;  %v2404_v49 = vld [vmem:[#allocation3 + $0x18] sm:$0xff] }
 0x56a   : > { %v2232_v11 = vadd.f32 %v4996_v52, %v2209_v5 }
 0x56b   : > { %4169 = vmatprep.subr.bf16.mxu0 %v4168_v36  ;;  %v2233_v34 = vadd.f32 %v4996_v52, %v2210_v35 }
 0x56c   : > { %4171 = vmatpush3.bf16.msra.mxu0 %v4168_v36  ;;  %v4333_v36 = vmov (!%p3569_p6), 0  }
 0x56d   : > { %v4172_v13 = vpack.c.bf16 %v2233_v34, %v2232_v11  ;;  %4287 = vset.pattern.permute.xlu1 (!%p3569_p6), %v4333_v36  ;;  %4286 = vset.pattern.permute.xlu0 (!%p3569_p6), %v4333_v36 }
 0x56f   : > { %4173 = vmatprep.subr.bf16.mxu0 %v4172_v13 }
 0x570   : > { %4175 = vmatpush3.bf16.msra.mxu0 %v4172_v13 }
 0x573   : > { %3987 = vmatmul.mubr.msk.f32.vlgmr.msra.gmra.mrb[36].mxu0 %vm2249_vm8, %v4332_v46 }
 0x574   : > { %3989 = vmatprep.mubr.msk.f32.mxu0 %vm2250_vm9, %v4332_v46 }
 0x577   : > { %3990 = vmatmul.mubr.msk.f32.gmra.mrb[38].mxu0 %vm2251_vm10, %v4332_v46 }
 0x578   : > { %3992 = vmatprep.mubr.msk.f32.mxu0 %vm2252_vm11, %v4332_v46 }
 0x57b   : > { %3993 = vmatmul.mubr.msk.f32.gmra.mrb[40].mxu0 %vm2253_vm12, %v4332_v46 }
 0x57c   : > { %3995 = vmatprep.mubr.msk.f32.mxu0 %vm2254_vm13, %v4332_v46 }
 0x57f   : > { %3996 = vmatmul.mubr.msk.f32.gmra.mrb[42].mxu0 %vm2255_vm14, %v4332_v46  ;;  %v2406_v46 = vld [vmem:[#allocation3 + $0x28] sm:$0xff] }
 0x5b9   : > { %v4032_v47 = vpop.f32.mrb[32].mxu1 }
 0x5ba   : > { %v2475_v44 = vpop.f32.mrb[33].mxu1  ;;  %v2515_v48 = vadd.f32 %v4032_v47, %v2402_v59 }
 0x5bb   : > { %v2514_v50 = vadd.f32 %v2475_v44, %v2401_v8 }
 0x5bc   : > { %2524 = vst.msk [vmem:[#allocation3 + $0x8] sm:$0xff] %vm2522_vm15, %v2515_v48 }
 0x5bd   : > { %2523 = vst.msk [vmem:[#allocation3] sm:$0xff] %vm2522_vm15, %v2514_v50  ;;  %v4035_v51 = vpop.f32.mrb[34].mxu1 }
 0x5be   : > { %v2485_v52 = vpop.f32.mrb[35].mxu1  ;;  %v2517_v38 = vadd.f32 %v4035_v51, %v2404_v49 }
 0x5bf   : > { %v2516_v61 = vadd.f32 %v2485_v52, %v2403_v53 }
 0x5c0   : > { %2526 = vst.msk [vmem:[#allocation3 + $0x18] sm:$0xff] %vm2522_vm15, %v2517_v38 }
 0x5c1   : > { %2525 = vst.msk [vmem:[#allocation3 + $0x10] sm:$0xff] %vm2522_vm15, %v2516_v61  ;;  %v4038_v43 = vpop.f32.mrb[36].mxu1 }
 0x5c2   : > { %v2495_v40 = vpop.f32.mrb[37].mxu1  ;;  %v2519_v21 = vadd.f32 %v4038_v43, %v2406_v46 }
 0x5c3   : > { %v2518_v22 = vadd.f32 %v2495_v40, %v2405_v56  ;;  %v2536_v13 = vld [vmem:[#allocation3 + $0x8] sm:$0xff] (!%p3569_p6) }
 0x5c4   : > { %2528 = vst.msk [vmem:[#allocation3 + $0x28] sm:$0xff] %vm2522_vm15, %v2519_v21  ;;  %v2535_v4 = vld [vmem:[#allocation3] sm:$0xff] (!%p3569_p6)  ;;  %v2544_v8 = vmax.f32 (!%p3569_p6), %v2536_v13, 1.0 }
 0x5c5   : > { %2527 = vst.msk [vmem:[#allocation3 + $0x20] sm:$0xff] %vm2522_vm15, %v2518_v22  ;;  %v4041_v23 = vpop.f32.mrb[38].mxu1  ;;  %v2543_v11 = vmax.f32 (!%p3569_p6), %v2535_v4, 1.0 }
 0x5c6   : > { %v2505_v28 = vpop.f32.mrb[39].mxu1  ;;  %v2521_v2 = vadd.f32 %v4041_v23, %v2408_v33 }
 0x5c7   : > { %v2520_v30 = vadd.f32 %v2505_v28, %v2407_v16  ;;  %v2538_v5 = vld [vmem:[#allocation3 + $0x18] sm:$0xff] (!%p3569_p6) }
 0x5c8   : > { %2530 = vst.msk [vmem:[#allocation3 + $0x38] sm:$0xff] %vm2522_vm15, %v2521_v2  ;;  %v2537_v26 = vld [vmem:[#allocation3 + $0x10] sm:$0xff] (!%p3569_p6)  ;;  %v2546_v34 = vmax.f32 (!%p3569_p6), %v2538_v5, 1.0 }
 0x5c9   : > { %2529 = vst.msk [vmem:[#allocation3 + $0x30] sm:$0xff] %vm2522_vm15, %v2520_v30  ;;  %v2545_v35 = vmax.f32 (!%p3569_p6), %v2537_v26, 1.0 }
 0x5cb   : > { %v2540_v47 = vld [vmem:[#allocation3 + $0x28] sm:$0xff] (!%p3569_p6)  ;;  %4288 = vrcp.f32 (!%p3569_p6), %v2545_v35 }
 0x5cc   : > { %v2539_v59 = vld [vmem:[#allocation3 + $0x20] sm:$0xff] (!%p3569_p6)  ;;  %v2548_v48 = vmax.f32 (!%p3569_p6), %v2540_v47, 1.0  ;;  %4290 = vrcp.f32 (!%p3569_p6), %v2543_v11 }
 0x5cd   : > { %v2547_v51 = vmax.f32 (!%p3569_p6), %v2539_v59, 1.0  ;;  %4292 = vrcp.f32 (!%p3569_p6), %v2546_v34 }
 0x5ce   : > { %4294 = vrcp.f32 (!%p3569_p6), %v2544_v8 }
 0x5cf   : > { %v2542_v44 = vld [vmem:[#allocation3 + $0x38] sm:$0xff] (!%p3569_p6)  ;;  %4296 = vrcp.f32 (!%p3569_p6), %v2548_v48 }
 0x5d0   : > { %v2541_v50 = vld [vmem:[#allocation3 + $0x30] sm:$0xff] (!%p3569_p6)  ;;  %v2550_v49 = vmax.f32 (!%p3569_p6), %v2542_v44, 1.0  ;;  %4298 = vrcp.f32 (!%p3569_p6), %v2547_v51 }
 0x5d1   : > { %v2549_v53 = vmax.f32 (!%p3569_p6), %v2541_v50, 1.0 }
 0x5d2   : > { %4300 = vrcp.f32 (!%p3569_p6), %v2550_v49 }
 0x5d3   : > { %4302 = vrcp.f32 (!%p3569_p6), %v2549_v53 }
 0x5d5   : > { %v4289_v52 = vpop.eup (!%p3569_p6), %4288 }
 0x5d6   : > { %v4291_v38 = vpop.eup (!%p3569_p6), %4290  ;;  %v2561_v61 = vmul.f32 (!%p3569_p6), %v4289_v52, %v2545_v35 }
 0x5d7   : > { %v4293_v43 = vpop.eup (!%p3569_p6), %4292  ;;  %v2559_v46 = vmul.f32 (!%p3569_p6), %v4291_v38, %v2543_v11 }
 0x5d8   : > { %v4295_v56 = vpop.eup (!%p3569_p6), %4294  ;;  %v2569_v40 = vsub.f32 (!%p3569_p6), 2.0, %v2561_v61  ;;  %v2562_v21 = vmul.f32 (!%p3569_p6), %v4293_v43, %v2546_v34 }
 0x5d9   : > { %v4297_v22 = vpop.eup (!%p3569_p6), %4296  ;;  %v2567_v23 = vsub.f32 (!%p3569_p6), 2.0, %v2559_v46  ;;  %v2560_v33 = vmul.f32 (!%p3569_p6), %v4295_v56, %v2544_v8 }
 0x5da   : > { %v4299_v16 = vpop.eup (!%p3569_p6), %4298  ;;  %v2577_v28 = vmul.f32 (!%p3569_p6), %v4289_v52, %v2569_v40  ;;  %v2570_v2 = vsub.f32 (!%p3569_p6), 2.0, %v2562_v21  ;;  %v2564_v30 = vmul.f32 (!%p3569_p6), %v4297_v22, %v2548_v48 }
 0x5dc   : > { %2603 = vperm.xlu1 (!%p3569_p6), %4287, %v2577_v28  }
 0x646   : > { %v3988_v32 = vpop.f32.mrb[36].mxu0 }
 0x647   : > { %v2386_v55 = vadd.f32 %v3988_v32, %v2273_v17  ;;  %v2346_v54 = vpop.f32.mrb[37].mxu0  ;;  %v4301_v17 = vpop.eup (!%p3569_p6), %4300  ;;  %v2568_v32 = vsub.f32 (!%p3569_p6), 2.0, %v2560_v33 }
 0x648   : > { %v2385_v37 = vadd.f32 %v2346_v54, %v2272_v31  ;;  %v2575_v31 = vmul.f32 (!%p3569_p6), %v4291_v38, %v2567_v23  ;;  %v4303_v54 = vpop.eup (!%p3569_p6), %4302 }
 0x649   : > { %2394 = vst.msk [vmem:[#allocation2 + $0x8] sm:$0xff] %vm1978_vm6, %v2386_v55  ;;  %v2563_v55 = vmul.f32 (!%p3569_p6), %v4299_v16, %v2547_v51 }
 0x64a   : > { %2393 = vst.msk [vmem:[#allocation2] sm:$0xff] %vm1978_vm6, %v2385_v37  ;;  %v3991_v18 = vpop.f32.mrb[38].mxu0  ;;  %v2578_v37 = vmul.f32 (!%p3569_p6), %v4293_v43, %v2570_v2  ;;  %2593 = vperm.xlu0 (!%p3569_p6), %4286, %v2575_v31  }
 0x64b   : > { %v2388_v39 = vadd.f32 %v3991_v18, %v2275_v45  ;;  %v2356_v41 = vpop.f32.mrb[39].mxu0  ;;  %v2572_v45 = vsub.f32 (!%p3569_p6), 2.0, %v2564_v30  ;;  %v2640_v18 = vld [vmem:[%s5282_s14] sm:$0xff] (!%p3569_p6) }
 0x64c   : > { %v2387_v57 = vadd.f32 %v2356_v41, %v2274_v27  ;;  %v2566_v27 = vmul.f32 (!%p3569_p6), %v4301_v17, %v2550_v49  ;;  %v2576_v41 = vmul.f32 (!%p3569_p6), %v4295_v56, %v2568_v32  ;;  %2608 = vperm.xlu1 (!%p3569_p6), %4287, %v2578_v37   ;;  %v3586_v56 = vld [vmem:[%s5283_s15] ss:$0 sm:$0xff] (!%p3569_p6) }
 0x64d   : > { %2396 = vst.msk [vmem:[#allocation2 + $0x18] sm:$0xff] %vm1978_vm6, %v2388_v39  ;;  %v2641_v39 = vld [vmem:[%s5282_s14 + $0x8] sm:$0xff] (!%p3569_p6) }
 0x64e   : > { %2395 = vst.msk [vmem:[#allocation2 + $0x10] sm:$0xff] %vm1978_vm6, %v2387_v57  ;;  %v3994_v1 = vpop.f32.mrb[40].mxu0  ;;  %v2571_v57 = vsub.f32 (!%p3569_p6), 2.0, %v2563_v55  ;;  %2598 = vperm.xlu0 (!%p3569_p6), %4286, %v2576_v41  }
 0x64f   : > { %v2390_v24 = vadd.f32 %v3994_v1, %v2277_v42  ;;  %v2366_v58 = vpop.f32.mrb[41].mxu0  ;;  %v2565_v42 = vmul.f32 (!%p3569_p6), %v4303_v54, %v2549_v53  ;;  %v2580_v1 = vmul.f32 (!%p3569_p6), %v4297_v22, %v2572_v45 }
 0x650   : > { %v2389_v12 = vadd.f32 %v2366_v58, %v2276_v29  ;;  %2534 = sbr.rel (%p3569_p6) target bundleno = 2750 (0xabe), region = 116  ;;  %v4192_v29 = vpack.c.bf16 (!%p3569_p6), %v2641_v39, %v2640_v18  ;;  %v2579_v58 = vmul.f32 (!%p3569_p6), %v4299_v16, %v2571_v57  ;;  %v2584_v5 = vld [vmem:[#allocation2 + $0x8] sm:$0xff] (!%p3569_p6) }
 0x651   : > { %2398 = vst.msk [vmem:[#allocation2 + $0x28] sm:$0xff] %vm1978_vm6, %v2390_v24  ;;  %v2574_v24 = vsub.f32 (!%p3569_p6), 2.0, %v2566_v27  ;;  %2618 = vperm.xlu1 (!%p3569_p6), %4287, %v2580_v1  }
 0x652   : > { %2397 = vst.msk [vmem:[#allocation2 + $0x20] sm:$0xff] %vm1978_vm6, %v2389_v12  ;;  %v3997_v62 = vpop.f32.mrb[42].mxu0  ;;  %4193 = vmatprep.subr.bf16.mxu0 (!%p3569_p6), %v4192_v29  ;;  %v2573_v12 = vsub.f32 (!%p3569_p6), 2.0, %v2565_v42  ;;  %2613 = vperm.xlu0 (!%p3569_p6), %4286, %v2579_v58  }
 0x653   : > { %v2392_v63 = vadd.f32 %v3997_v62, %v2279_v60  ;;  %v2376_v0 = vpop.f32.mrb[43].mxu0  ;;  %4195 = vmatpush3.bf16.msra.mxu0 (!%p3569_p6), %v4192_v29  ;;  %v2639_v60 = vld [vmem:[%s5281_s13] sm:$0xff] (!%p3569_p6) }
 0x654   : > { %v2391_v25 = vadd.f32 %v2376_v0, %v2278_v3  ;;  %4058 = vmatprep.subr.mxu0 (!%p3569_p6), %v2639_v60  ;;  %v2582_v3 = vmul.f32 (!%p3569_p6), %v4301_v17, %v2574_v24  ;;  %v2581_v62 = vmul.f32 (!%p3569_p6), %v4303_v54, %v2573_v12  ;;  %v2586_v13 = vld [vmem:[#allocation2 + $0x18] sm:$0xff] (!%p3569_p6) }
 0x655   : > { %2400 = vst.msk [vmem:[#allocation2 + $0x38] sm:$0xff] %vm1978_vm6, %v2392_v63  ;;  %v2583_v63 = vld [vmem:[#allocation2] sm:$0xff] (!%p3569_p6)  ;;  %v2585_v26 = vld [vmem:[#allocation2 + $0x10] sm:$0xff] (!%p3569_p6) }
 0x656   : > { %2399 = vst.msk [vmem:[#allocation2 + $0x30] sm:$0xff] %vm1978_vm6, %v2391_v25  ;;  %2628 = vperm.xlu1 (!%p3569_p6), %4287, %v2582_v3   ;;  %2623 = vperm.xlu0 (!%p3569_p6), %4286, %v2581_v62  }
 0x658   : > { %v2588_v50 = vld [vmem:[#allocation2 + $0x28] sm:$0xff] }
 0x659   : > { %v2587_v47 = vld [vmem:[#allocation2 + $0x20] sm:$0xff] }
 0x65b   : > { %v2604_v0 = vpop.permute.xlu1 %2603 }
 0x65c   : > { %v2633_v35 = vmul.f32 %v2604_v0, %v2585_v26  ;;  %v2590_v38 = vld [vmem:[#allocation2 + $0x38] sm:$0xff] }
 0x65d   : > { %v2589_v51 = vld [vmem:[#allocation2 + $0x30] sm:$0xff]  ;;  %v3090_v26 = vld [vmem:[%s5286_s18 + $0x18] sm:$0xff] }
 0x6c9   : > { %v2594_v25 = vpop.permute.xlu0 %2593 }
 0x6ca   : > { %v2631_v4 = vmul.f32 %v2594_v25, %v2583_v63  ;;  %v3089_v25 = vld [vmem:[%s5286_s18 + $0x10] sm:$0xff] }
 0x6cb   : > { %v2609_v36 = vpop.permute.xlu1 %2608 }
 0x6cc   : > { %4046 = vmatprep.mubr.msk.f32.mxu0 %vm1978_vm6, %v2631_v4  ;;  %v2634_v44 = vmul.f32 %v2609_v36, %v2586_v13  ;;  %v4208_v4 = vpack.c.bf16 %v3090_v26, %v3089_v25 }
 0x6cd   : > { %v2599_v11 = vpop.permute.xlu0 %2598 }
 0x6ce   : > { %v2632_v34 = vmul.f32 %v2599_v11, %v2584_v5  ;;  %v3587_v5 = vld [vmem:[%s5285_s17] ss:$0 sm:$0xff] }
 0x6d0   : > { %4047 = vmatmul.mubr.msk.f32.vlgmr.msra.gmra.mrb[0].mxu0 %vm1978_vm6, %v2632_v34  ;;  %v2619_v59 = vpop.permute.xlu1 %2618 }
 0x6d1   : > { %4059 = vmatpush3.msra.mxu0 %v2639_v60  ;;  %4049 = vmatprep.mubr.msk.f32.mxu0 %vm1978_vm6, %v2633_v35  ;;  %v2614_v8 = vpop.permute.xlu0 %2613  ;;  %v2636_v53 = vmul.f32 %v2619_v59, %v2588_v50 }
 0x6d2   : > { %v2635_v48 = vmul.f32 %v2614_v8, %v2587_v47 }
 0x6d4   : > { %4050 = vmatmul.mubr.msk.f32.gmra.mrb[2].mxu0 %vm1978_vm6, %v2634_v44 }
 0x6d5   : > { %4052 = vmatprep.mubr.msk.f32.mxu0 %vm1978_vm6, %v2635_v48  ;;  %v2624_v49 = vpop.permute.xlu0 %2623  ;;  %v2629_v61 = vpop.permute.xlu1 %2628 }
 0x6d6   : > { %v2637_v52 = vmul.f32 %v2624_v49, %v2589_v51  ;;  %v2638_v43 = vmul.f32 %v2629_v61, %v2590_v38 }
 0x6d8   : > { %4053 = vmatmul.mubr.msk.f32.gmra.mrb[4].mxu0 %vm1978_vm6, %v2636_v53 }
 0x6d9   : > { %4055 = vmatprep.mubr.msk.f32.mxu0 %vm1978_vm6, %v2637_v52 }
 0x6dc   : > { %4056 = vmatmul.mubr.msk.f32.gmra.mrb[6].mxu0 %vm1978_vm6, %v2638_v43 }
 0x6dd   : > { %4060 = vmatprep.mubr.msk.f32.mxu0 %vm1063_vm2, %v4494_v6  ;;  %v2931_v6 = vld [vmem:[%s5284_s16] sm:$0xff] }
 0x6e0   : > { %4061 = vmatmul.mubr.msk.f32.vlgmr.msra.gmra.mrb[0].mxu0 %vm1063_vm2, %v4499_v7  ;;  %v2932_v7 = vld [vmem:[%s5284_s16 + $0x8] sm:$0xff] }
 0x6e1   : > { %4063 = vmatprep.mubr.msk.f32.mxu0 %vm1063_vm2, %v4506_v9  ;;  %v4196_v9 = vpack.c.bf16 %v2932_v7, %v2931_v6 }
 0x6e3   : > { %4197 = vmatprep.subr.bf16.mxu1 %v4196_v9 }
 0x6e4   : > { %4064 = vmatmul.mubr.msk.f32.gmra.mrb[2].mxu0 %vm1063_vm2, %v4511_v10  ;;  %4199 = vmatpush3.bf16.msra.mxu1 %v4196_v9  ;;  %v2933_v10 = vld [vmem:[%s5284_s16 + $0x10] sm:$0xff] }
 0x6e5   : > { %4066 = vmatprep.mubr.msk.f32.mxu0 %vm1063_vm2, %v4520_v14  ;;  %v2934_v14 = vld [vmem:[%s5284_s16 + $0x18] sm:$0xff] }
 0x6e8   : > { %4067 = vmatmul.mubr.msk.f32.gmra.mrb[4].mxu0 %vm1063_vm2, %v4525_v15  ;;  %v4200_v15 = vpack.c.bf16 %v2934_v14, %v2933_v10 }
 0x6e9   : > { %4069 = vmatprep.mubr.msk.f32.mxu0 %vm1063_vm2, %v4534_v19  ;;  %v3087_v19 = vld [vmem:[%s5286_s18] sm:$0xff] }
 0x6ea   : > { %4201 = vmatprep.subr.bf16.mxu1 %v4200_v15 }
 0x6eb   : > { %4203 = vmatpush3.bf16.msra.mxu1 %v4200_v15 }
 0x6ec   : > { %4070 = vmatmul.mubr.msk.f32.gmra.mrb[6].mxu0 %vm1063_vm2, %v4539_v20  ;;  %v3088_v20 = vld [vmem:[%s5286_s18 + $0x8] sm:$0xff] }
 0x6ed   : > { %v4204_v46 = vpack.c.bf16 %v3088_v20, %v3087_v19 }
 0x6ef   : > { %4205 = vmatprep.subr.bf16.mxu1 %v4204_v46 }
 0x7b3   : > { %v4062_v40 = vpop.f32.mrb[0].mxu0 }
 0x7b4   : > { %v2908_v21 = vadd.f32 %v4062_v40, %v3586_v56  ;;  %v2861_v22 = vpop.f32.mrb[1].mxu0 }
 0x7b5   : > { %v2907_v23 = vadd.f32 %v3586_v56, %v2861_v22 }
 0x7b6   : > { %v2916_v33 = vmul.f32 0.01, %v2908_v21 }
 0x7b7   : > { %v4065_v16 = vpop.f32.mrb[2].mxu0  ;;  %v2915_v28 = vmul.f32 0.01, %v2907_v23 }
 0x7b8   : > { %v2910_v2 = vadd.f32 %v4065_v16, %v3586_v56  ;;  %v2871_v30 = vpop.f32.mrb[3].mxu0  ;;  %v2924_v32 = vmax.f32 %v2908_v21, %v2916_v33  ;;  %v3596_v33 = vld [vmem:[%s5287_s19] ss:$0 sm:$0xff] }
 0x7b9   : > { %v2909_v17 = vadd.f32 %v3586_v56, %v2871_v30  ;;  %v2923_v31 = vmax.f32 %v2907_v23, %v2915_v28 }
 0x7ba   : > { %v2918_v55 = vmul.f32 0.01, %v2910_v2 }
 0x7bb   : > { %v2917_v54 = vmul.f32 0.01, %v2909_v17  ;;  %v4068_v37 = vpop.f32.mrb[4].mxu0  ;;  %4080 = vmatprep.mubr.msk.f32.mxu1 %vm1516_vm3, %v2923_v31 }
 0x7bc   : > { %v2912_v45 = vadd.f32 %v4068_v37, %v3586_v56  ;;  %v2881_v27 = vpop.f32.mrb[5].mxu0  ;;  %4081 = vmatmul.mubr.msk.f32.vlgmr.msra.gmra.mrb[0].mxu1 %vm1516_vm3, %v2924_v32  ;;  %v2926_v41 = vmax.f32 %v2910_v2, %v2918_v55 }
 0x7bd   : > { %v2925_v18 = vmax.f32 %v2909_v17, %v2917_v54  ;;  %v2911_v39 = vadd.f32 %v3586_v56, %v2881_v27  ;;  %4207 = vmatpush3.bf16.msra.mxu1 %v4204_v46 }
 0x7be   : > { %v2920_v57 = vmul.f32 0.01, %v2912_v45  ;;  %4209 = vmatprep.subr.bf16.mxu1 %v4208_v4 }
 0x7bf   : > { %v2919_v42 = vmul.f32 0.01, %v2911_v39  ;;  %v4071_v29 = vpop.f32.mrb[6].mxu0  ;;  %4083 = vmatprep.mubr.msk.f32.mxu1 %vm1516_vm3, %v2925_v18 }
 0x7c0   : > { %v2914_v1 = vadd.f32 %v4071_v29, %v3586_v56  ;;  %v2891_v24 = vpop.f32.mrb[7].mxu0  ;;  %4084 = vmatmul.mubr.msk.f32.gmra.mrb[2].mxu1 %vm1516_vm3, %v2926_v41  ;;  %v2928_v60 = vmax.f32 %v2912_v45, %v2920_v57 }
 0x7c1   : > { %v2927_v58 = vmax.f32 %v2911_v39, %v2919_v42  ;;  %v2913_v12 = vadd.f32 %v3586_v56, %v2891_v24  ;;  %4211 = vmatpush3.bf16.msra.mxu1 %v4208_v4 }
 0x7c2   : > { %v2922_v3 = vmul.f32 0.01, %v2914_v1 }
 0x7c3   : > { %v2921_v62 = vmul.f32 0.01, %v2913_v12  ;;  %4086 = vmatprep.mubr.msk.f32.mxu1 %vm1516_vm3, %v2927_v58 }
 0x7c4   : > { %4087 = vmatmul.mubr.msk.f32.gmra.mrb[4].mxu1 %vm1516_vm3, %v2928_v60  ;;  %v2930_v0 = vmax.f32 %v2914_v1, %v2922_v3 }
 0x7c5   : > { %v2929_v63 = vmax.f32 %v2913_v12, %v2921_v62 }
 0x7c7   : > { %4089 = vmatprep.mubr.msk.f32.mxu1 %vm1516_vm3, %v2929_v63 }
 0x7c8   : > { %4090 = vmatmul.mubr.msk.f32.gmra.mrb[6].mxu1 %vm1516_vm3, %v2930_v0 }
 0x88f   : > { %v4082_v36 = vpop.f32.mrb[0].mxu1 }
 0x890   : > { %v3038_v35 = vadd.f32 %v4082_v36, %v3587_v5  ;;  %v3032_v11 = vpop.f32.mrb[1].mxu1 }
 0x891   : > { %v3033_v34 = vadd.f32 %v3587_v5, %v3032_v11 }
 0x892   : > { %v3072_v13 = vmul.f32 0.01, %v3038_v35 }
 0x893   : > { %v3071_v47 = vmul.f32 0.01, %v3033_v34  ;;  %v4085_v59 = vpop.f32.mrb[2].mxu1 }
 0x894   : > { %v3048_v8 = vadd.f32 %v4085_v59, %v3587_v5  ;;  %v3042_v44 = vpop.f32.mrb[3].mxu1  ;;  %v3080_v51 = vmax.f32 %v3038_v35, %v3072_v13 }
 0x895   : > { %v3079_v48 = vmax.f32 %v3033_v34, %v3071_v47  ;;  %v3043_v50 = vadd.f32 %v3587_v5, %v3042_v44 }
 0x896   : > { %v3074_v49 = vmul.f32 0.01, %v3048_v8 }
 0x897   : > { %v3073_v53 = vmul.f32 0.01, %v3043_v50  ;;  %v4088_v52 = vpop.f32.mrb[4].mxu1  ;;  %4100 = vmatprep.mubr.msk.f32.mxu1 %vm1516_vm3, %v3079_v48 }
 0x898   : > { %v3058_v38 = vadd.f32 %v4088_v52, %v3587_v5  ;;  %v3052_v61 = vpop.f32.mrb[5].mxu1  ;;  %4101 = vmatmul.mubr.msk.f32.vlgmr.msra.gmra.mrb[8].mxu1 %vm1516_vm3, %v3080_v51  ;;  %v3082_v7 = vmax.f32 %v3048_v8, %v3074_v49 }
 0x899   : > { %v3081_v43 = vmax.f32 %v3043_v50, %v3073_v53  ;;  %v3053_v6 = vadd.f32 %v3587_v5, %v3052_v61 }
 0x89a   : > { %v3076_v9 = vmul.f32 0.01, %v3058_v38 }
 0x89b   : > { %v3075_v10 = vmul.f32 0.01, %v3053_v6  ;;  %v4091_v14 = vpop.f32.mrb[6].mxu1  ;;  %4103 = vmatprep.mubr.msk.f32.mxu1 %vm1516_vm3, %v3081_v43 }
 0x89c   : > { %v3068_v15 = vadd.f32 %v4091_v14, %v3587_v5  ;;  %v3062_v19 = vpop.f32.mrb[7].mxu1  ;;  %4104 = vmatmul.mubr.msk.f32.gmra.mrb[10].mxu1 %vm1516_vm3, %v3082_v7  ;;  %v3084_v56 = vmax.f32 %v3058_v38, %v3076_v9 }
 0x89d   : > { %v3083_v20 = vmax.f32 %v3053_v6, %v3075_v10  ;;  %v3063_v46 = vadd.f32 %v3587_v5, %v3062_v19 }
 0x89e   : > { %v3078_v40 = vmul.f32 0.01, %v3068_v15 }
 0x89f   : > { %v3077_v21 = vmul.f32 0.01, %v3063_v46  ;;  %4106 = vmatprep.mubr.msk.f32.mxu1 %vm1516_vm3, %v3083_v20 }
 0x8a0   : > { %4107 = vmatmul.mubr.msk.f32.gmra.mrb[12].mxu1 %vm1516_vm3, %v3084_v56  ;;  %v3086_v23 = vmax.f32 %v3068_v15, %v3078_v40 }
 0x8a1   : > { %v3085_v22 = vmax.f32 %v3063_v46, %v3077_v21 }
 0x8a3   : > { %4109 = vmatprep.mubr.msk.f32.mxu1 %vm1516_vm3, %v3085_v22 }
 0x8a4   : > { %4110 = vmatmul.mubr.msk.f32.gmra.mrb[14].mxu1 %vm1516_vm3, %v3086_v23 }
 0x96b   : > { %v4102_v16 = vpop.f32.mrb[8].mxu1 }
 0x96c   : > { %v3194_v28 = vadd.f32 %v4102_v16, %v3596_v33  ;;  %v3188_v2 = vpop.f32.mrb[9].mxu1 }
 0x96d   : > { %v3189_v30 = vadd.f32 %v3596_v33, %v3188_v2 }
 0x96e   : > { %v3228_v17 = vmul.f32 0.01, %v3194_v28 }
 0x96f   : > { %v3227_v31 = vmul.f32 0.01, %v3189_v30  ;;  %v4105_v32 = vpop.f32.mrb[10].mxu1 }
 0x970   : > { %v3204_v55 = vadd.f32 %v4105_v32, %v3596_v33  ;;  %v3198_v54 = vpop.f32.mrb[11].mxu1  ;;  %v3236_v37 = vmax.f32 %v3194_v28, %v3228_v17 }
 0x971   : > { %v3199_v45 = vadd.f32 %v3596_v33, %v3198_v54  ;;  %v3235_v27 = vmax.f32 %v3189_v30, %v3227_v31 }
 0x972   : > { %v3230_v18 = vmul.f32 0.01, %v3204_v55  ;;  %v3246_v39 = vsel %vm1978_vm6, %v3236_v37, 0.0 }
 0x973   : > { %v3229_v41 = vmul.f32 0.01, %v3199_v45  ;;  %3247 = vadd.xlane.f32.xlu1 %v3246_v39  ;;  %v4108_v57 = vpop.f32.mrb[12].mxu1  ;;  %v3243_v42 = vsel %vm1978_vm6, %v3235_v27, 0.0 }
 0x974   : > { %v3214_v29 = vadd.f32 %v4108_v57, %v3596_v33  ;;  %v3208_v1 = vpop.f32.mrb[13].mxu1  ;;  %3244 = vadd.xlane.f32.xlu0 %v3243_v42  ;;  %v3238_v24 = vmax.f32 %v3204_v55, %v3230_v18 }
 0x975   : > { %v3209_v58 = vadd.f32 %v3596_v33, %v3208_v1  ;;  %v3237_v60 = vmax.f32 %v3199_v45, %v3229_v41 }
 0x976   : > { %v3252_v12 = vsel %vm1978_vm6, %v3238_v24, 0.0  ;;  %v3232_v3 = vmul.f32 0.01, %v3214_v29 }
 0x977   : > { %v3231_v62 = vmul.f32 0.01, %v3209_v58  ;;  %v4111_v63 = vpop.f32.mrb[14].mxu1  ;;  %v3249_v5 = vsel %vm1978_vm6, %v3237_v60, 0.0 }
 0x978   : > { %v3224_v0 = vadd.f32 %v4111_v63, %v3596_v33  ;;  %3253 = vadd.xlane.f32.xlu0 %v3252_v12  ;;  %v3218_v25 = vpop.f32.mrb[15].mxu1  ;;  %v3240_v34 = vmax.f32 %v3214_v29, %v3232_v3 }
 0x979   : > { %v3219_v26 = vadd.f32 %v3596_v33, %v3218_v25  ;;  %v3239_v4 = vmax.f32 %v3209_v58, %v3231_v62 }
 0x97a   : > { %v3234_v36 = vmul.f32 0.01, %v3224_v0  ;;  %v3258_v47 = vsel %vm1978_vm6, %v3240_v34, 0.0 }
 0x97b   : > { %v3233_v35 = vmul.f32 0.01, %v3219_v26  ;;  %v3255_v11 = vsel %vm1978_vm6, %v3239_v4, 0.0 }
 0x97c   : > { %3256 = vadd.xlane.f32.xlu1 %v3255_v11  ;;  %3250 = vadd.xlane.f32.xlu0 %v3249_v5  ;;  %v3242_v8 = vmax.f32 %v3224_v0, %v3234_v36  ;;  %v3605_v11 = vld [vmem:[%s5288_s20] ss:$0 sm:$0xff] }
 0x97d   : > { %v3241_v13 = vmax.f32 %v3219_v26, %v3233_v35 }
 0x97e   : > { %v3264_v44 = vsel %vm1978_vm6, %v3242_v8, 0.0 }
 0x97f   : > { %v3261_v59 = vsel %vm1978_vm6, %v3241_v13, 0.0 }
 0x980   : > { %3259 = vadd.xlane.f32.xlu0 %v3258_v47  ;;  %3262 = vadd.xlane.f32.xlu1 %v3261_v59 }
 0x984   : > { %3265 = vadd.xlane.f32.xlu0 %v3264_v44 }
 0xa00   : > { %v3248_v48 = vpop.xlane.xlu1 %3247 }
 0xa01   : > { %v3268_v50 = vmul.f32 0.0625, %v3248_v48  ;;  %v3245_v51 = vpop.xlane.xlu0 %3244 }
 0xa02   : > { %v3267_v49 = vmul.f32 0.0625, %v3245_v51 }
 0xa03   : > { %v5179_v53 = vsub.f32 %v3236_v37, %v3268_v50 }
 0xa04   : > { %v5181_v52 = vsub.f32 %v3235_v27, %v3267_v49 }
 0xa05   : > { %v3254_v38 = vpop.xlane.xlu0 %3253  ;;  %v3284_v61 = vmul.f32 %v5179_v53, %v5179_v53 }
 0xa06   : > { %v3270_v43 = vmul.f32 0.0625, %v3254_v38  ;;  %v3283_v6 = vmul.f32 %v5181_v52, %v5181_v52 }
 0xa07   : > { %v3294_v7 = vsel %vm1978_vm6, %v3284_v61, 0.0 }
 0xa08   : > { %v5188_v9 = vsub.f32 %v3238_v24, %v3270_v43  ;;  %3295 = vadd.xlane.f32.xlu0 %v3294_v7  ;;  %v3291_v10 = vsel %vm1978_vm6, %v3283_v6, 0.0 }
 0xa09   : > { %v3257_v14 = vpop.xlane.xlu1 %3256  ;;  %v3251_v15 = vpop.xlane.xlu0 %3250  ;;  %3292 = vadd.xlane.f32.xlu1 %v3291_v10 }
 0xa0a   : > { %v3271_v19 = vmul.f32 0.0625, %v3257_v14  ;;  %v3269_v20 = vmul.f32 0.0625, %v3251_v15  ;;  %v3286_v46 = vmul.f32 %v5188_v9, %v5188_v9 }
 0xa0c   : > { %v5193_v56 = vsub.f32 %v3239_v4, %v3271_v19  ;;  %v5195_v40 = vsub.f32 %v3237_v60, %v3269_v20  ;;  %v3300_v21 = vsel %vm1978_vm6, %v3286_v46, 0.0 }
 0xa0d   : > { %v3260_v22 = vpop.xlane.xlu0 %3259  ;;  %3301 = vadd.xlane.f32.xlu0 %v3300_v21  ;;  %v3263_v23 = vpop.xlane.xlu1 %3262 }
 0xa0e   : > { %v3272_v33 = vmul.f32 0.0625, %v3260_v22  ;;  %v3273_v16 = vmul.f32 0.0625, %v3263_v23  ;;  %v3285_v28 = vmul.f32 %v5195_v40, %v5195_v40  ;;  %v3287_v31 = vmul.f32 %v5193_v56, %v5193_v56 }
 0xa10   : > { %v5200_v2 = vsub.f32 %v3240_v34, %v3272_v33  ;;  %v5202_v30 = vsub.f32 %v3241_v13, %v3273_v16  ;;  %v3297_v17 = vsel %vm1978_vm6, %v3285_v28, 0.0  ;;  %v3303_v27 = vsel %vm1978_vm6, %v3287_v31, 0.0 }
 0xa11   : > { %v3266_v32 = vpop.xlane.xlu0 %3265  ;;  %3298 = vadd.xlane.f32.xlu1 %v3297_v17 }
 0xa12   : > { %v3274_v55 = vmul.f32 0.0625, %v3266_v32  ;;  %v3288_v54 = vmul.f32 %v5200_v2, %v5200_v2  ;;  %v3289_v18 = vmul.f32 %v5202_v30, %v5202_v30 }
 0xa14   : > { %v5209_v37 = vsub.f32 %v3242_v8, %v3274_v55  ;;  %v3306_v45 = vsel %vm1978_vm6, %v3288_v54, 0.0  ;;  %v3309_v57 = vsel %vm1978_vm6, %v3289_v18, 0.0  ;;  %v3606_v8 = vld [vmem:[%s5289_s21] ss:$0 sm:$0xff] }
 0xa15   : > { %3307 = vadd.xlane.f32.xlu0 %v3306_v45  ;;  %3304 = vadd.xlane.f32.xlu1 %v3303_v27 }
 0xa16   : > { %v3290_v39 = vmul.f32 %v5209_v37, %v5209_v37 }
 0xa18   : > { %v3312_v41 = vsel %vm1978_vm6, %v3290_v39, 0.0 }
 0xa19   : > { %3313 = vadd.xlane.f32.xlu0 %v3312_v41  ;;  %3310 = vadd.xlane.f32.xlu1 %v3309_v57 }
 0xa95   : > { %v3296_v42 = vpop.xlane.xlu0 %3295 }
 0xa96   : > { %v3316_v29 = vmul.f32 0.0625, %v3296_v42  ;;  %v3293_v1 = vpop.xlane.xlu1 %3292 }
 0xa97   : > { %v3315_v24 = vmul.f32 0.0625, %v3293_v1 }
 0xa98   : > { %v3324_v58 = vadd.f32 1e-05, %v3316_v29 }
 0xa99   : > { %v3323_v12 = vadd.f32 1e-05, %v3315_v24 }
 0xa9a   : > { %4304 = vrsqrt.f32 %v3324_v58  ;;  %v3302_v60 = vpop.xlane.xlu0 %3301 }
 0xa9b   : > { %4306 = vrsqrt.f32 %v3323_v12  ;;  %v3318_v3 = vmul.f32 0.0625, %v3302_v60 }
 0xa9d   : > { %v3326_v62 = vadd.f32 1e-05, %v3318_v3 }
 0xa9e   : > { %v3299_v63 = vpop.xlane.xlu1 %3298 }
 0xa9f   : > { %4308 = vrsqrt.f32 %v3326_v62  ;;  %v3317_v0 = vmul.f32 0.0625, %v3299_v63 }
 0xaa1   : > { %v3325_v25 = vadd.f32 1e-05, %v3317_v0 }
 0xaa2   : > { %v3308_v26 = vpop.xlane.xlu0 %3307  ;;  %v3305_v4 = vpop.xlane.xlu1 %3304 }
 0xaa3   : > { %4310 = vrsqrt.f32 %v3325_v25  ;;  %v3320_v5 = vmul.f32 0.0625, %v3308_v26  ;;  %v3319_v36 = vmul.f32 0.0625, %v3305_v4 }
 0xaa4   : > { %v4305_v35 = vpop.eup %4304 }
 0xaa5   : > { %v4307_v34 = vpop.eup %4306  ;;  %v3340_v13 = vmul.f32 %v4305_v35, %v5179_v53  ;;  %v3328_v47 = vadd.f32 1e-05, %v3320_v5  ;;  %v3327_v59 = vadd.f32 1e-05, %v3319_v36 }
 0xaa6   : > { %v3339_v44 = vmul.f32 %v4307_v34, %v5181_v52  ;;  %v3314_v48 = vpop.xlane.xlu0 %3313  ;;  %v3311_v50 = vpop.xlane.xlu1 %3310 }
 0xaa7   : > { %v3355_v51 = vmul.f32 %v3605_v11, %v3340_v13  ;;  %4312 = vrsqrt.f32 %v3328_v47  ;;  %v3322_v49 = vmul.f32 0.0625, %v3314_v48  ;;  %v3321_v38 = vmul.f32 0.0625, %v3311_v50 }
 0xaa8   : > { %v3354_v61 = vmul.f32 %v3605_v11, %v3339_v44  ;;  %4314 = vrsqrt.f32 %v3327_v59 }
 0xaa9   : > { %v4309_v43 = vpop.eup %4308  ;;  %v3370_v6 = vadd.f32 %v3606_v8, %v3355_v51  ;;  %v3330_v7 = vadd.f32 1e-05, %v3322_v49  ;;  %v3329_v53 = vadd.f32 1e-05, %v3321_v38 }
 0xaaa   : > { %v3369_v10 = vadd.f32 %v3606_v8, %v3354_v61  ;;  %v3342_v14 = vmul.f32 %v4309_v43, %v5188_v9 }
 0xaab   : > { %3378 = vst.msk [vmem:[%s5311_s25 + $0x8] sm:$0xff] %vm1978_vm6, %v3370_v6  ;;  %4316 = vrsqrt.f32 %v3330_v7 }
 0xaac   : > { %3377 = vst.msk [vmem:[%s5311_s25] sm:$0xff] %vm1978_vm6, %v3369_v10  ;;  %v3357_v52 = vmul.f32 %v3605_v11, %v3342_v14  ;;  %4318 = vrsqrt.f32 %v3329_v53 }
 0xaad   : > { %v4311_v15 = vpop.eup %4310 }
 0xaae   : > { %v3372_v19 = vadd.f32 %v3606_v8, %v3357_v52  ;;  %v3341_v20 = vmul.f32 %v4311_v15, %v5195_v40 }
 0xab0   : > { %3380 = vst.msk [vmem:[%s5311_s25 + $0x18] sm:$0xff] %vm1978_vm6, %v3372_v19  ;;  %v3356_v9 = vmul.f32 %v3605_v11, %v3341_v20 }
 0xab1   : > { %v4313_v46 = vpop.eup %4312 }
 0xab2   : > { %v4315_v21 = vpop.eup %4314  ;;  %v3371_v22 = vadd.f32 %v3606_v8, %v3356_v9  ;;  %v3344_v23 = vmul.f32 %v4313_v46, %v5200_v2 }
 0xab3   : > { %v3343_v33 = vmul.f32 %v4315_v21, %v5193_v56 }
 0xab4   : > { %3379 = vst.msk [vmem:[%s5311_s25 + $0x10] sm:$0xff] %vm1978_vm6, %v3371_v22  ;;  %v3359_v16 = vmul.f32 %v3605_v11, %v3344_v23 }
 0xab5   : > { %v4317_v40 = vpop.eup %4316  ;;  %v3358_v28 = vmul.f32 %v3605_v11, %v3343_v33 }
 0xab6   : > { %v4319_v17 = vpop.eup %4318  ;;  %v3374_v31 = vadd.f32 %v3606_v8, %v3359_v16  ;;  %v3346_v32 = vmul.f32 %v4317_v40, %v5209_v37 }
 0xab7   : > { %v3373_v55 = vadd.f32 %v3606_v8, %v3358_v28  ;;  %v3345_v54 = vmul.f32 %v4319_v17, %v5202_v30 }
 0xab8   : > { %3382 = vst.msk [vmem:[%s5311_s25 + $0x28] sm:$0xff] %vm1978_vm6, %v3374_v31  ;;  %v3361_v56 = vmul.f32 %v3605_v11, %v3346_v32 }
 0xab9   : > { %3381 = vst.msk [vmem:[%s5311_s25 + $0x20] sm:$0xff] %vm1978_vm6, %v3373_v55  ;;  %v3360_v2 = vmul.f32 %v3605_v11, %v3345_v54 }
 0xaba   : > { %v3376_v45 = vadd.f32 %v3606_v8, %v3361_v56 }
 0xabb   : > { %v3375_v27 = vadd.f32 %v3606_v8, %v3360_v2 }
 0xabc   : > { %3384 = vst.msk [vmem:[%s5311_s25 + $0x38] sm:$0xff] %vm1978_vm6, %v3376_v45 }
 0xabd   : > { %3383 = vst.msk [vmem:[%s5311_s25 + $0x30] sm:$0xff] %vm1978_vm6, %v3375_v27 }
 0xabe PF: > { %s5312_s2 = sld [smem:[#allocation4_spill]] }
 0xac4   : > { %s32_s3 = sadd.s32 1, %s5312_s2  }
 0xac5   : > { %p29_p7 = scmp.ge.s32.totalorder %s32_s3, 5  }
 0xac7   :  { %31 = sbr.rel (!%p29_p7) target bundleno = 9 (0x9), region = 148 }

</bundles_post_ra>
